<compile_context>
chip_gen: v7x
topology: tpu7x:2x2x1
jax: 0.10.0
libtpu: 0.0.40
codegen_flags: <defaults>
</compile_context>

<pallas_src>
import functools

import jax
import jax.numpy as jnp
from jax.experimental import pallas as pl
from jax.experimental.pallas import tpu as pltpu


def _graphconv_kernel(project_first,
                      a_ref,      # (TN, TK)   adjacency block (0/1, narrow dtype)
                      h_ref,      # (TK, Fmid) pre-normalized (+pre-projected) src feats
                      fd_ref,     # (TN, Fin)  raw dst-tile features (residual path)
                      dstn_ref,   # (TN, 1)    in_deg^{-1/2} (or 1/in_deg, or 1)
                      *rest):
    # rest = [w_ref (only if aggregate-first)], lw_ref, b_ref, out_ref, acc_ref
    if project_first:
        lw_ref, b_ref, out_ref, acc_ref = rest
        w_ref = None
    else:
        w_ref, lw_ref, b_ref, out_ref, acc_ref = rest

    k = pl.program_id(1)

    @pl.when(k == 0)
    def _init():
        acc_ref[...] = jnp.zeros_like(acc_ref)

    # Hot path: aggregate this source tile into the accumulator (MXU, f32 acc).
    acc_ref[...] += jnp.dot(a_ref[...].astype(jnp.float32), h_ref[...],
                            preferred_element_type=jnp.float32)

    @pl.when(k == pl.num_programs(1) - 1)
    def _epilogue():
        # Fold dst-side norm in BEFORE the projection (commutes; narrower tensor).
        agg = acc_ref[...] * dstn_ref[...]
        if project_first:
            rst = agg                                         # already (TN, Fout)
        else:
            rst = jnp.dot(agg, w_ref[...],
                          preferred_element_type=jnp.float32)  # (TN, Fout_pad)
        loop_msg = jnp.dot(fd_ref[...], lw_ref[...],
                           preferred_element_type=jnp.float32)
        out_ref[...] = rst + b_ref[...] + loop_msg


def graph_conv(adj, feat, weight, loop_w, bias, *, norm='both',
               tile_n=256, tile_k=512, adj_dtype=jnp.bfloat16,
               vmem_limit_bytes=64 * 1024 * 1024):
    """adj: (N, N) dense 0/1 adjacency (A[d, s]=1 for edge s->d), float32.
    feat: (N, Fin).  weight/loop_w: (Fin, Fout).  bias: (Fout,).

    tile_n tiles the destination-node axis, tile_k tiles the source-node
    (reduction) axis.  For v7x (64 MiB VMEM/TC) prefer smaller tile_k than on
    v6e/v5e.  adj_dtype=bf16 is exact for 0/1 and halves the dominant N^2 HBM
    stream (int8 is also lossless on v5e/v6e)."""
    N, Fin = feat.shape
    Fout = weight.shape[1]

    tile_n = min(tile_n, N)
    tile_k = min(tile_k, N)
    assert N % tile_n == 0 and N % tile_k == 0, "N must be divisible by tiles"

    # ---- graph-structure bookkeeping (glue, not the hot path) ----
    adj_f32 = adj.astype(jnp.float32)
    out_deg = jnp.maximum(adj_f32.sum(axis=0), 1.0)   # out_deg[s] = #edges from s
    in_deg = jnp.maximum(adj_f32.sum(axis=1), 1.0)    # in_deg[d]  = #edges into d
    if norm == 'both':
        src_norm = out_deg ** -0.5
        dst_norm = in_deg ** -0.5
    elif norm == 'right':
        src_norm = jnp.ones_like(out_deg)
        dst_norm = 1.0 / in_deg
    else:  # 'none'
        src_norm = jnp.ones_like(out_deg)
        dst_norm = jnp.ones_like(in_deg)
    src_norm = src_norm.astype(jnp.float32)
    dst_norm = dst_norm.reshape(N, 1).astype(jnp.float32)

    project_first = Fin > Fout   # matches the PyTorch branch on feature sizes

    # ---- one-time prep (single XLA ops, NOT redone per destination tile) ----
    # Fold the source-side norm into the features once; in the project-first
    # branch also project the whole source set by W once, so the kernel's
    # K-loop is a pure A @ h stream.
    h_src = feat.astype(jnp.float32) * src_norm[:, None]          # (N, Fin)
    if project_first:
        h_src = jnp.dot(h_src, weight.astype(jnp.float32),
                        preferred_element_type=jnp.float32)        # (N, Fout)

    # Lane-dense epilogue/output path: pad Fout to a multiple of 128 lanes
    # (aggregate-first branch only -- in the project-first branch this would
    # inflate the streamed h_src by Fout_pad/Fout, which is not worth it).
    if (not project_first) and (Fout % 128 != 0):
        fout_pad = ((Fout + 127) // 128) * 128
    else:
        fout_pad = Fout
    pad = fout_pad - Fout
    w_p = jnp.pad(weight.astype(jnp.float32), ((0, 0), (0, pad)))
    lw_p = jnp.pad(loop_w.astype(jnp.float32), ((0, 0), (0, pad)))
    b_p = jnp.pad(bias.astype(jnp.float32), (0, pad)).reshape(1, fout_pad)

    f_mid = fout_pad if project_first else Fin     # accumulator / h_src width
    feat_f32 = feat.astype(jnp.float32)
    adj_c = adj_f32.astype(adj_dtype)              # 0/1 -> exact in bf16/int8

    kernel = functools.partial(_graphconv_kernel, project_first)

    in_specs = [
        pl.BlockSpec((tile_n, tile_k), lambda i, k: (i, k)),   # adjacency block
        pl.BlockSpec((tile_k, f_mid), lambda i, k: (k, 0)),    # normalized src feats
        pl.BlockSpec((tile_n, Fin), lambda i, k: (i, 0)),      # dst-tile feats (resident over k)
        pl.BlockSpec((tile_n, 1), lambda i, k: (i, 0)),        # dst norm
    ]
    args = [adj_c, h_src, feat_f32, dst_norm]
    if not project_first:
        in_specs.append(pl.BlockSpec((Fin, fout_pad), lambda i, k: (0, 0)))  # W
        args.append(w_p)
    in_specs += [
        pl.BlockSpec((Fin, fout_pad), lambda i, k: (0, 0)),    # residual weight
        pl.BlockSpec((1, fout_pad), lambda i, k: (0, 0)),      # bias
    ]
    args += [lw_p, b_p]

    out = pl.pallas_call(
        kernel,
        out_shape=jax.ShapeDtypeStruct((N, fout_pad), jnp.float32),
        grid_spec=pltpu.PrefetchScalarGridSpec(
            num_scalar_prefetch=0,
            grid=(N // tile_n, N // tile_k),        # (dst tiles, src/K tiles)
            in_specs=in_specs,
            out_specs=pl.BlockSpec((tile_n, fout_pad), lambda i, k: (i, 0)),
            scratch_shapes=[pltpu.VMEM((tile_n, f_mid), jnp.float32)],
        ),
        compiler_params=pltpu.CompilerParams(
            dimension_semantics=("parallel", "arbitrary"),
            vmem_limit_bytes=vmem_limit_bytes),
    )(*args)

    return out[:, :Fout] if fout_pad != Fout else out


def _reference(adj, feat, weight, loop_w, bias):
    """Plain-JAX mirror of the PyTorch forward (norm='both', residual=True)."""
    out_deg = jnp.maximum(adj.sum(axis=0), 1.0)
    in_deg = jnp.maximum(adj.sum(axis=1), 1.0)
    h = feat * (out_deg ** -0.5)[:, None]
    loop_msg = feat @ loop_w
    if feat.shape[1] > weight.shape[1]:
        rst = adj @ (h @ weight)
    else:
        rst = (adj @ h) @ weight
    rst = rst * (in_deg ** -0.5)[:, None]
    rst = rst + bias
    return rst + loop_msg


if __name__ == "__main__":
    N = 256
    key = jax.random.PRNGKey(0)
    k_adj, k_feat, k_w, k_lw, k_feat2, k_w2, k_lw2 = jax.random.split(key, 7)

    # Random graph with self-loops -> no zero in/out degree nodes.
    adj = jax.random.bernoulli(k_adj, p=0.1, shape=(N, N)).astype(jnp.float32)
    adj = jnp.clip(adj + jnp.eye(N, dtype=jnp.float32), 0.0, 1.0)

    # --- case 1: in_feats < out_feats  (aggregate-first branch) ---
    IN_FEATS, OUT_FEATS = 16, 32
    feat = jax.random.normal(k_feat, (N, IN_FEATS), dtype=jnp.float32)
    xav = (6.0 / (IN_FEATS + OUT_FEATS)) ** 0.5
    weight = jax.random.uniform(k_w, (IN_FEATS, OUT_FEATS),
                                minval=-xav, maxval=xav, dtype=jnp.float32)
    lin_bound = 1.0 / (IN_FEATS ** 0.5)
    loop_w = jax.random.uniform(k_lw, (IN_FEATS, OUT_FEATS),
                                minval=-lin_bound, maxval=lin_bound,
                                dtype=jnp.float32)
    bias = jnp.zeros((OUT_FEATS,), dtype=jnp.float32)

    out = graph_conv(adj, feat, weight, loop_w, bias, norm='both',
                     tile_n=128, tile_k=128)            # grid (2, 2): exercises K accumulation
    out = jax.block_until_ready(out)
    ref = _reference(adj, feat, weight, loop_w, bias)
    assert out.shape == (N, OUT_FEATS)
    assert jnp.allclose(out, ref, atol=1e-4, rtol=1e-4)

    # --- case 2: in_feats > out_feats  (project-first branch) ---
    IN2, OUT2 = 64, 16
    feat2 = jax.random.normal(k_feat2, (N, IN2), dtype=jnp.float32)
    xav2 = (6.0 / (IN2 + OUT2)) ** 0.5
    weight2 = jax.random.uniform(k_w2, (IN2, OUT2),
                                 minval=-xav2, maxval=xav2, dtype=jnp.float32)
    bound2 = 1.0 / (IN2 ** 0.5)
    loop_w2 = jax.random.uniform(k_lw2, (IN2, OUT2),
                                 minval=-bound2, maxval=bound2, dtype=jnp.float32)
    bias2 = jnp.zeros((OUT2,), dtype=jnp.float32)

    out2 = graph_conv(adj, feat2, weight2, loop_w2, bias2, norm='both',
                      tile_n=128, tile_k=128)
    out2 = jax.block_until_ready(out2)
    ref2 = _reference(adj, feat2, weight2, loop_w2, bias2)
    assert out2.shape == (N, OUT2)
    assert jnp.allclose(out2, ref2, atol=1e-4, rtol=1e-4)

    print("KERNEL_OK")
</pallas_src>

<mosaic_0001>
module attributes {stable_mosaic.version = 11 : i64} {
  func.func @_graphconv_kernel(%arg0: i32, %arg1: i32, %arg2: memref<128x128xbf16, #tpu.memory_space<vmem>>, %arg3: memref<128x16xf32, #tpu.memory_space<vmem>>, %arg4: memref<128x16xf32, #tpu.memory_space<vmem>>, %arg5: memref<128x1xf32, #tpu.memory_space<vmem>>, %arg6: memref<16x128xf32, #tpu.memory_space<vmem>>, %arg7: memref<16x128xf32, #tpu.memory_space<vmem>>, %arg8: memref<1x128xf32, #tpu.memory_space<vmem>>, %arg9: memref<128x128xf32, #tpu.memory_space<vmem>>, %arg10: memref<128x16xf32, #tpu.memory_space<vmem>>) attributes {dimension_semantics = [#tpu.dimension_semantics<parallel>, #tpu.dimension_semantics<arbitrary>], iteration_bounds = array<i64: 2, 2>, scalar_prefetch = 0 : i64, scratch_operands = 1 : i64, tpu.core_type = #tpu.core_type<tc>, window_params = [{transform_indices = @transform_0, window_bounds = array<i64: 128, 128>}, {transform_indices = @transform_1, window_bounds = array<i64: 128, 16>}, {transform_indices = @transform_2, window_bounds = array<i64: 128, 16>}, {transform_indices = @transform_3, window_bounds = array<i64: 128, 1>}, {pipeline_mode = #tpu.pipeline_mode<synchronous>, transform_indices = @transform_4, window_bounds = array<i64: 16, 128>}, {pipeline_mode = #tpu.pipeline_mode<synchronous>, transform_indices = @transform_5, window_bounds = array<i64: 16, 128>}, {pipeline_mode = #tpu.pipeline_mode<synchronous>, transform_indices = @transform_6, window_bounds = array<i64: 1, 128>}, {transform_indices = @transform_7, window_bounds = array<i64: 128, 128>}]} {
    %c0_i32 = arith.constant 0 : i32
    %0 = arith.cmpi eq, %arg1, %c0_i32 : i32
    %1 = arith.extui %0 : i1 to i32
    %c0_i32_0 = arith.constant 0 : i32
    %2 = arith.cmpi ne, %1, %c0_i32_0 : i32
    scf.if %2 {
      %cst_9 = arith.constant 0.000000e+00 : f32
      %13 = vector.broadcast %cst_9 : f32 to vector<128x16xf32>
      %c0_10 = arith.constant 0 : index
      %c0_11 = arith.constant 0 : index
      %14 = vector.load %arg10[%c0_10, %c0_11] : memref<128x16xf32, #tpu.memory_space<vmem>>, vector<128x16xf32>
      tpu.vector_store %arg10[%c0_10, %c0_11], %13 {strides = array<i32>} : memref<128x16xf32, #tpu.memory_space<vmem>>, vector<128x16xf32>,
    } else {
    }
    %c0 = arith.constant 0 : index
    %c0_1 = arith.constant 0 : index
    %3 = vector.load %arg10[%c0, %c0_1] : memref<128x16xf32, #tpu.memory_space<vmem>>, vector<128x16xf32>
    %c0_2 = arith.constant 0 : index
    %c0_3 = arith.constant 0 : index
    %4 = vector.load %arg2[%c0_2, %c0_3] : memref<128x128xbf16, #tpu.memory_space<vmem>>, vector<128x128xbf16>
    %5 = arith.extf %4 : vector<128x128xbf16> to vector<128x128xf32>
    %c0_4 = arith.constant 0 : index
    %c0_5 = arith.constant 0 : index
    %6 = vector.load %arg3[%c0_4, %c0_5] : memref<128x16xf32, #tpu.memory_space<vmem>>, vector<128x16xf32>
    %cst = arith.constant dense<0.000000e+00> : vector<128x16xf32>
    %7 = tpu.matmul %5, %6, %cst {dimension_numbers = #tpu.dot_dimension_numbers<[1], [0], [0], [1], [0, 0, 1, 1], [], []>} : vector<128x128xf32>, vector<128x16xf32>, vector<128x16xf32> -> vector<128x16xf32>
    %8 = arith.addf %3, %7 : vector<128x16xf32>
    %c0_6 = arith.constant 0 : index
    %c0_7 = arith.constant 0 : index
    %9 = vector.load %arg10[%c0_6, %c0_7] : memref<128x16xf32, #tpu.memory_space<vmem>>, vector<128x16xf32>
    tpu.vector_store %arg10[%c0_6, %c0_7], %8 {strides = array<i32>} : memref<128x16xf32, #tpu.memory_space<vmem>>, vector<128x16xf32>,
    %c1_i32 = arith.constant 1 : i32
    %10 = arith.cmpi eq, %arg1, %c1_i32 : i32
    %11 = arith.extui %10 : i1 to i32
    %c0_i32_8 = arith.constant 0 : i32
    %12 = arith.cmpi ne, %11, %c0_i32_8 : i32
    scf.if %12 {
      %c0_9 = arith.constant 0 : index
      %c0_10 = arith.constant 0 : index
      %13 = vector.load %arg10[%c0_9, %c0_10] : memref<128x16xf32, #tpu.memory_space<vmem>>, vector<128x16xf32>
      %c0_11 = arith.constant 0 : index
      %c0_12 = arith.constant 0 : index
      %14 = vector.load %arg5[%c0_11, %c0_12] : memref<128x1xf32, #tpu.memory_space<vmem>>, vector<128x1xf32>
      %15 = vector.broadcast %14 : vector<128x1xf32> to vector<128x16xf32>
      %16 = arith.mulf %13, %15 : vector<128x16xf32>
      %c0_13 = arith.constant 0 : index
      %c0_14 = arith.constant 0 : index
      %17 = vector.load %arg6[%c0_13, %c0_14] : memref<16x128xf32, #tpu.memory_space<vmem>>, vector<16x128xf32>
      %cst_15 = arith.constant dense<0.000000e+00> : vector<128x128xf32>
      %18 = tpu.matmul %16, %17, %cst_15 {dimension_numbers = #tpu.dot_dimension_numbers<[1], [0], [0], [1], [0, 0, 1, 1], [], []>} : vector<128x16xf32>, vector<16x128xf32>, vector<128x128xf32> -> vector<128x128xf32>
      %c0_16 = arith.constant 0 : index
      %c0_17 = arith.constant 0 : index
      %19 = vector.load %arg4[%c0_16, %c0_17] : memref<128x16xf32, #tpu.memory_space<vmem>>, vector<128x16xf32>
      %c0_18 = arith.constant 0 : index
      %c0_19 = arith.constant 0 : index
      %20 = vector.load %arg7[%c0_18, %c0_19] : memref<16x128xf32, #tpu.memory_space<vmem>>, vector<16x128xf32>
      %cst_20 = arith.constant dense<0.000000e+00> : vector<128x128xf32>
      %21 = tpu.matmul %19, %20, %cst_20 {dimension_numbers = #tpu.dot_dimension_numbers<[1], [0], [0], [1], [0, 0, 1, 1], [], []>} : vector<128x16xf32>, vector<16x128xf32>, vector<128x128xf32> -> vector<128x128xf32>
      %c0_21 = arith.constant 0 : index
      %c0_22 = arith.constant 0 : index
      %22 = vector.load %arg8[%c0_21, %c0_22] : memref<1x128xf32, #tpu.memory_space<vmem>>, vector<1x128xf32>
      %23 = vector.broadcast %22 : vector<1x128xf32> to vector<128x128xf32>
      %24 = arith.addf %18, %23 : vector<128x128xf32>
      %25 = arith.addf %24, %21 : vector<128x128xf32>
      %c0_23 = arith.constant 0 : index
      %c0_24 = arith.constant 0 : index
      %26 = vector.load %arg9[%c0_23, %c0_24] : memref<128x128xf32, #tpu.memory_space<vmem>>, vector<128x128xf32>
      tpu.vector_store %arg9[%c0_23, %c0_24], %25 {strides = array<i32>} : memref<128x128xf32, #tpu.memory_space<vmem>>, vector<128x128xf32>,
    } else {
    }
    return
  }
  func.func @transform_0(%arg0: i32, %arg1: i32) -> (i32, i32) {
    %c0_i32 = arith.constant 0 : i32
    return %arg0, %arg1 : i32, i32
  }
  func.func @transform_1(%arg0: i32, %arg1: i32) -> (i32, i32) {
    %c0_i32 = arith.constant 0 : i32
    %c0_i32_0 = arith.constant 0 : i32
    return %arg1, %c0_i32 : i32, i32
  }
  func.func @transform_2(%arg0: i32, %arg1: i32) -> (i32, i32) {
    %c0_i32 = arith.constant 0 : i32
    %c0_i32_0 = arith.constant 0 : i32
    return %arg0, %c0_i32 : i32, i32
  }
  func.func @transform_3(%arg0: i32, %arg1: i32) -> (i32, i32) {
    %c0_i32 = arith.constant 0 : i32
    %c0_i32_0 = arith.constant 0 : i32
    return %arg0, %c0_i32 : i32, i32
  }
  func.func @transform_4(%arg0: i32, %arg1: i32) -> (i32, i32) {
    %c0_i32 = arith.constant 0 : i32
    %c0_i32_0 = arith.constant 0 : i32
    %c0_i32_1 = arith.constant 0 : i32
    return %c0_i32, %c0_i32_0 : i32, i32
  }
  func.func @transform_5(%arg0: i32, %arg1: i32) -> (i32, i32) {
    %c0_i32 = arith.constant 0 : i32
    %c0_i32_0 = arith.constant 0 : i32
    %c0_i32_1 = arith.constant 0 : i32
    return %c0_i32, %c0_i32_0 : i32, i32
  }
  func.func @transform_6(%arg0: i32, %arg1: i32) -> (i32, i32) {
    %c0_i32 = arith.constant 0 : i32
    %c0_i32_0 = arith.constant 0 : i32
    %c0_i32_1 = arith.constant 0 : i32
    return %c0_i32, %c0_i32_0 : i32, i32
  }
  func.func @transform_7(%arg0: i32, %arg1: i32) -> (i32, i32) {
    %c0_i32 = arith.constant 0 : i32
    %c0_i32_0 = arith.constant 0 : i32
    return %arg0, %c0_i32 : i32, i32
  }
}

</mosaic_0001>

<bundles_post_ra>
// kernel: tpu_custom_call.1
= control target key start
LH: loop header
LB: loop body
LE: loop exit
PB: predicated region body
PF: predicated region fallthrough
CT: control target
= control target key end

     0   :  { %s3203_s0 = inlined_call_operand.hbm [shape: bf16[256,256], index: 0, kind: input, shape index: {}]   ;;  %s3204_s1 = inlined_call_operand.hbm [shape: f32[256,16], index: 1, kind: input, shape index: {}]   ;;  %s3205_s2 = inlined_call_operand.hbm [shape: f32[256,16], index: 2, kind: input, shape index: {}]   ;;  %s3206_s3 = inlined_call_operand.hbm [shape: f32[256,1], index: 3, kind: input, shape index: {}]   ;;  %s3207_s4 = inlined_call_operand.hbm [shape: f32[16,128], index: 4, kind: input, shape index: {}]   ;;  %s3208_s5 = inlined_call_operand.hbm [shape: f32[16,128], index: 5, kind: input, shape index: {}]   ;;  %s3209_s6 = inlined_call_operand.hbm [shape: f32[1,128], index: 6, kind: input, shape index: {}]   ;;  %s3210_s7 = inlined_call_operand.hbm [shape: f32[256,128], index: 7, kind: output, shape index: {}]  }
   0x1   :  { %3236 = sst [smem:[#allocation35_spill]] %s3203_s0 }
   0x2   :  { %3237 = sst [smem:[#allocation36_spill]] %s3204_s1 }
   0x3   :  { %3238 = sst [smem:[#allocation37_spill]] %s3205_s2 }
   0x4   :  { %3239 = sst [smem:[#allocation38_spill]] %s3206_s3 }
   0x5   :  { %3240 = sst [smem:[#allocation39_spill]] %s3207_s4 }
   0x6   :  { %3241 = sst [smem:[#allocation40_spill]] %s3208_s5 }
   0x7   :  { %3242 = sst [smem:[#allocation41_spill]] %s3209_s6 }
   0x8   :  { %3243 = sst [smem:[#allocation42_spill]] %s3210_s7 }
   0x9   :  { %12 = vsyncpa [#allocation4], 0 }
   0xa   :  { %14 = vsyncpa [#allocation4 + $0x1], 0 }
   0xb   :  { %15 = vsyncpa [#allocation7], 0 }
   0xc   :  { %17 = vsyncpa [#allocation7 + $0x1], 0 }
   0xd   :  { %18 = vsyncpa [#allocation10], 0 }
   0xe   :  { %20 = vsyncpa [#allocation10 + $0x1], 0 }
   0xf   :  { %21 = vsyncpa [#allocation13], 0 }
  0x10   :  { %22 = vsyncpa [#allocation5], 0 }
  0x11   :  { %24 = vsyncpa [#allocation5 + $0x1], 0  ;;  %s2501_s24 = smov 0   ;;  %s2503_s25 = smov 0  }
  0x12   :  { %s2505_s26 = smov 0   ;;  %s2507_s27 = smov 0  }
  0x13   :  { %s2509_s28 = smov 0   ;;  %s2511_s29 = smov 0  }
  0x14   :  { %s2513_s30 = smov 0   ;;  %s2515_s8 = smov 0  }
  0x15   :  { %s2517_s9 = smov 0   ;;  %s2519_s10 = smov 0  }
  0x16   :  { %s2521_s11 = smov 0   ;;  %s2523_s12 = smov 0  }
  0x17   :  { %s2525_s13 = smov 0   ;;  %s2527_s14 = smov 0  }
  0x18 LB: > { %3244 = sst [smem:[#allocation23_spill]] %s2391_s24  ;;  %s2572_s15 = sadd.s32 4294967295, %s2443_s14   ;;  %s2443_s14 = sphi %s2527_s14, %s30_s14   ;;  %s2439_s13 = sphi %s2525_s13, %s3317_s13   ;;  %s2435_s12 = sphi %s2523_s12, %s3316_s12   ;;  %s2431_s11 = sphi %s2521_s11, %s3315_s11   ;;  %s2427_s10 = sphi %s2519_s10, %s3314_s10   ;;  %s2423_s9 = sphi %s2517_s9, %s3313_s9   ;;  %s2419_s8 = sphi %s2515_s8, %s3324_s8   ;;  %s2415_s30 = sphi %s2513_s30, %s3323_s30   ;;  %s2411_s29 = sphi %s2511_s29, %s3322_s29   ;;  %s2407_s28 = sphi %s2509_s28, %s3321_s28   ;;  %s2403_s27 = sphi %s2507_s27, %s3320_s27   ;;  %s2399_s26 = sphi %s2505_s26, %s3319_s26   ;;  %s2395_s25 = sphi %s2503_s25, %s3318_s25   ;;  %s2391_s24 = sphi %s2501_s24, %s3310_s24  }
  0x19   : > { %3245 = sst [smem:[#allocation24_spill]] %s2395_s25  ;;  %p1512_p0 = scmp.ge.s32.totalorder %s2443_s14, 1 }
  0x1a   : > { %3246 = sst [smem:[#allocation25_spill]] %s2423_s9  ;;  %p3213_p1 = scmp.eq.s32.totalorder %s2572_s15, 0 }
  0x1b   : > { %3247 = sst [smem:[#allocation26_spill]] %s2427_s10  ;;  %p242_p3 = scmp.lt.s32.totalorder %s2443_s14, 5 }
  0x1c   : > { %3248 = sst [smem:[#allocation27_spill]] %s2431_s11  ;;  %s2445_s17 = smov [#allocation11]  }
  0x1d   : > { %3249 = sst [smem:[#allocation28_spill]] %s2435_s12  ;;  %p2578_p4 = pnand %p1512_p0, %p242_p3 }
  0x1e   : > { %3250 = sst [smem:[#allocation29_spill]] %s2439_s13  ;;  %s254_s18 = sshll.u32 %s2445_s17, 4  ;;  %s255_s18 = int_to_ptr.vmem [resolvable:$true] %s254_s18 }
  0x1f   : > { %s3251_s16 = scalar_select %p2578_p4, 1, 0 }
  0x20   : > { %p1913_p5 = pneg %p2578_p4  ;;  %s2446_s20 = smov [#allocation12]  }
  0x21   : > { %3252 = sst [smem:[#allocation30_spill]] %s3251_s16  ;;  %s267_s21 = sshll.u32 %s2446_s20, 4  ;;  %s2590_s21 = int_to_ptr.vmem [resolvable:$true] %s267_s21 }
  0x22   : > { %p2586_p6 = pnand %p1913_p5, %p3213_p1  ;;  %s3254_s4 = sld [smem:[#allocation39_spill]] }
  0x24   : > { %s3253_s19 = scalar_select %p2586_p6, 1, 0 }
  0x25   : > { %p2600_p8 = pneg %p2586_p6 }
  0x28   : > { %s2073_s7 = scalar_lea.hbm %s3254_s4, 256 }
  0x29   : > { %p2074_p7 = scmp.ne.s32.totalorder %s3254_s4, %s2073_s7  ;;  %p2080_p11 = scmp.lt.u32.totalorder %s2073_s7, %s3254_s4 }
  0x2b   : > { %p2076_p9 = pnand %p2600_p8, %p2074_p7 }
  0x2d   : > { %p2077_p10 = pneg %p2076_p9 }
  0x2f   : > { %p2082_p12 = pnand %p2080_p11, %p2077_p10 }
  0x31   : > { %2085 = shalt.err (!%p2082_p12)
}
  0x32   : > { %s2086_s22 = scalar_lea.vmem %s255_s18, 256  ;;  %p2094_p5 = scmp.lt.s32.totalorder %s255_s18, %s255_s18 }
  0x33   : > { %p2087_p13 = scmp.ne.s32.totalorder %s255_s18, %s2086_s22  ;;  %p2095_p2 = scmp.lt.s32.totalorder %s2086_s22, %s2086_s22 }
  0x35   : > { %p2089_p0 = pnand %p2087_p13, %p2600_p8  ;;  %p2096_p1 = por %p2095_p2, %p2094_p5 }
  0x37   : > { %p2090_p3 = pneg %p2089_p0 }
  0x39   : > { %p2097_p4 = pnand %p2096_p1, %p2090_p3 }
  0x3b   : > { %2100 = shalt.err (!%p2097_p4)
}
  0x3c   : > { %s3219_s10 = smov 128   ;;  %s3221_s11 = smov 8  }
  0x3d   : > { %1916 = dma.hbm_to_vmem [thread:$0]  (!%p2586_p6), %s3254_s4, 256, %s255_s18, [#allocation10], %s3219_s10, %s3219_s10, %s3221_s11  }
  0x3e   : > { %s3256_s5 = sld [smem:[#allocation40_spill]] }
  0x44   : > { %s2101_s3 = scalar_lea.hbm %s3256_s5, 256 }
  0x45   : > { %p2102_p1 = scmp.ne.s32.totalorder %s3256_s5, %s2101_s3  ;;  %p2108_p7 = scmp.lt.u32.totalorder %s2101_s3, %s3256_s5 }
  0x47   : > { %p2104_p2 = pnand %p2102_p1, %p2600_p8 }
  0x49   : > { %p2105_p4 = pneg %p2104_p2 }
  0x4b   : > { %p2110_p9 = pnand %p2108_p7, %p2105_p4 }
  0x4d   : > { %2113 = shalt.err (!%p2110_p9)
}
  0x4e   : > { %s2114_s18 = scalar_lea.vmem %s2590_s21, 256  ;;  %p2122_p13 = scmp.lt.s32.totalorder %s2590_s21, %s2590_s21 }
  0x4f   : > { %p2115_p10 = scmp.ne.s32.totalorder %s2590_s21, %s2114_s18  ;;  %p2123_p0 = scmp.lt.s32.totalorder %s2114_s18, %s2114_s18 }
  0x51   : > { %p2117_p11 = pnand %p2115_p10, %p2600_p8  ;;  %p2124_p3 = por %p2123_p0, %p2122_p13 }
  0x53   : > { %p2118_p12 = pneg %p2117_p11 }
  0x55   : > { %p2125_p5 = pnand %p2124_p3, %p2118_p12 }
  0x57   : > { %2128 = shalt.err (!%p2125_p5)
}
  0x58   : > { %1919 = dma.hbm_to_vmem [thread:$0]  (!%p2586_p6), %s3256_s5, 256, %s2590_s21, [#allocation13], %s3219_s10, %s3219_s10, %s3221_s11  }
  0x59   : > { %s39_s24 = sadd.s32 1, %s2435_s12  ;;  %s42_s25 = sadd.s32 1, %s2439_s13 }
  0x5a   : > { %p40_p1 = scmp.ge.s32.totalorder %s39_s24, 2  ;;  %p3226_p2 = scmp.eq.s32.totalorder %s2443_s14, 0 }
  0x5b   : > { %s77_s7 = sadd.s32 1, %s2411_s29  ;;  %p84_p4 = scmp.ne.s32.totalorder %s2411_s29, %s2407_s28 }
  0x5c   : > { %s3326_s24 = smov (%p40_p1, %s39_s24), 0  ;;  %s3328_s25 = smov (!%p40_p1, %s42_s25), %s2439_s13 }
  0x5d   : > { %3257 = sst [smem:[#allocation31_spill]] %s3326_s24  ;;  %s47_s16 = ssub.s32 %s2435_s12, %s3326_s24 }
  0x5e   : > { %p44_p7 = scmp.ge.s32.totalorder %s3328_s25, 2  ;;  %p75_p9 = scmp.eq.s32.totalorder %s47_s16, 0 }
  0x5f   : > { %p2658_p10 = por %p84_p4, %p3226_p2  ;;  %p90_p11 = scmp.ne.s32.totalorder %s2407_s28, %s2403_s27 }
  0x60   : > { %s3330_s25 = smov (%p44_p7, %s3328_s25), 0  ;;  %p3261_p12 = scmp.eq.s32.totalorder %s2572_s15, 0 }
  0x61   : > { %3259 = sst [smem:[#allocation32_spill]] %s3330_s25  ;;  %s2671_s20 = ssub.s32 %s2439_s13, %s3330_s25 }
  0x62   : > { %s2667_s23 = scalar_select %p75_p9, %s2411_s29, %s77_s7  }
  0x63   : > { %p2675_p13 = por %p90_p11, %p3261_p12  ;;  %s48_s18 = sor.u32 %s47_s16, %s2671_s20 }
  0x64   : > { %3260 = sst [smem:[#allocation33_spill]] %s2667_s23  ;;  %p2681_p3 = scmp.eq.s32.totalorder %s48_s18, 0 }
  0x65   : > { %s3262_s22 = scalar_select %p2675_p13, 1, 0 }
  0x66   : > { %s3263_s27 = scalar_select %p2681_p3, 1, 0 }
  0x67   : > { %p3225_p5 = scmp.lt.s32.totalorder %s2443_s14, 4  ;;  %s3229_s2 = sand.u32 1, %s2443_s14  }
  0x68   : > { %s317_s3 = sand.u32 1, %s2411_s29   ;;  %s1580_s10 = sshll.u32 %s2435_s12, 11 }
  0x69   : > { %s1521_s7 = sshll.u32 %s317_s3, 7  ;;  %s3264_s1 = sld [smem:[#allocation36_spill]] }
  0x6a   : > { %s319_s25 = scalar_lea.vmem [#allocation6], %s1521_s7  ;;  %p2700_p1 = pnand %p3225_p5, %p2658_p10 }
  0x6b   : > { %s326_s16 = sshll.u32 %s319_s25, 4  ;;  %s2449_s3 = smov [#allocation14]   ;;  %s2694_s16 = int_to_ptr.vmem [resolvable:$true] %s326_s16 }
  0x6c   : > { %s2704_s4 = sshll.u32 %s2449_s3, 4  ;;  %p2131_p7 = pneg %p2700_p1  ;;  %s282_s4 = int_to_ptr.vmem [resolvable:$true] %s2704_s4 }
  0x6f   : > { %s2692_s5 = scalar_lea.hbm %s3264_s1, %s1580_s10  ;;  %s2708_s10 = scalar_lea.sflag [#allocation7], %s3229_s2 }
  0x70   : > { %s2129_s11 = scalar_lea.hbm %s2692_s5, 2048  ;;  %s2134_s7 = scalar_lea.hbm %s3264_s1, 4096 }
  0x71   : > { %p2130_p4 = scmp.ne.s32.totalorder %s2692_s5, %s2129_s11  ;;  %p2135_p10 = scmp.lt.u32.totalorder %s2692_s5, %s3264_s1 }
  0x72   : > { %p2136_p12 = scmp.lt.u32.totalorder %s2134_s7, %s2129_s11  ;;  %p2138_p5 = scmp.lt.u32.totalorder %s2129_s11, %s2692_s5 }
  0x73   : > { %p2132_p9 = pnand %p2131_p7, %p2130_p4 }
  0x74   : > { %p2137_p0 = por %p2136_p12, %p2135_p10 }
  0x75   : > { %p2133_p11 = pneg %p2132_p9 }
  0x76   : > { %p2139_p2 = por %p2138_p5, %p2137_p0 }
  0x78   : > { %p2140_p13 = pnand %p2139_p2, %p2133_p11 }
  0x7a   : > { %2143 = shalt.err (!%p2140_p13)
}
  0x7b   : > { %s2144_s3 = scalar_lea.vmem %s2694_s16, 2048  ;;  %s2450_s25 = smov [#allocation6]  }
  0x7c   : > { %p2145_p4 = scmp.ne.s32.totalorder %s2694_s16, %s2144_s3  ;;  %s2149_s21 = sshll.u32 %s2450_s25, 4  ;;  %s2150_s21 = int_to_ptr.vmem [resolvable:$false] %s2149_s21 }
  0x7d   : > { %s2151_s24 = scalar_lea.vmem %s2150_s21, 4096  ;;  %p2152_p6 = scmp.lt.s32.totalorder %s2694_s16, %s2150_s21 }
  0x7e   : > { %p2147_p9 = pnand %p2145_p4, %p2131_p7  ;;  %p2153_p10 = scmp.lt.s32.totalorder %s2151_s24, %s2144_s3 }
  0x80   : > { %p2148_p3 = pneg %p2147_p9  ;;  %p2154_p12 = por %p2153_p10, %p2152_p6 }
  0x82   : > { %p2155_p0 = pnand %p2154_p12, %p2148_p3 }
  0x84   : > { %2158 = shalt.err (!%p2155_p0)
}
  0x85   : > { %s3266_s23 = smov 8   ;;  %s3267_s11 = smov 128  }
  0x86   : > { %1929 = dma.hbm_to_vmem [thread:$0]  (!%p2700_p1), %s2692_s5, 2048, %s2694_s16, %s2708_s10, %s3267_s11, %s3267_s11, %s3266_s23  }
  0x87   : > { %s3268_s6 = sld [smem:[#allocation41_spill]] }
  0x8d   : > { %s2159_s21 = scalar_lea.hbm %s3268_s6, 16 }
  0x8e   : > { %p2160_p6 = scmp.ne.s32.totalorder %s3268_s6, %s2159_s21  ;;  %p2166_p3 = scmp.lt.u32.totalorder %s2159_s21, %s3268_s6 }
  0x90   : > { %p2162_p2 = pnand %p2160_p6, %p2600_p8 }
  0x92   : > { %p2163_p13 = pneg %p2162_p2 }
  0x94   : > { %p2168_p5 = pnand %p2166_p3, %p2163_p13 }
  0x96   : > { %2171 = shalt.err (!%p2168_p5)
}
  0x97   : > { %s2172_s1 = scalar_lea.vmem %s282_s4, 16  ;;  %s2179_s5 = scalar_lea.vmem %s282_s4, 32 }
  0x98   : > { %p2173_p1 = scmp.ne.s32.totalorder %s282_s4, %s2172_s1  ;;  %p2180_p4 = scmp.lt.s32.totalorder %s282_s4, %s282_s4 }
  0x99   : > { %p2181_p9 = scmp.lt.s32.totalorder %s2179_s5, %s2172_s1 }
  0x9a   : > { %p2175_p7 = pnand %p2173_p1, %p2600_p8 }
  0x9b   : > { %p2182_p10 = por %p2181_p9, %p2180_p4 }
  0x9c   : > { %p2176_p11 = pneg %p2175_p7 }
  0x9e   : > { %p2183_p12 = pnand %p2182_p10, %p2176_p11 }
  0xa0   : > { %2186 = shalt.err (!%p2183_p12)
}
  0xa1   : > { %p3269_p0 = scmp.ne.s32.totalorder %s3253_s19, 0  ;;  %s51_s1 = sadd.s32 1, %s2423_s9 }
  0xa2   : > { %p3270_p8 = scmp.ne.s32.totalorder %s3263_s27, 0  ;;  %p58_p6 = scmp.ne.s32.totalorder %s2423_s9, %s2419_s8 }
  0xa3   : > { %1922 = dma.hbm_to_vmem [thread:$0]  (!%p3269_p0), %s3268_s6, 16, %s282_s4, [#allocation13]  }
  0xa4   : > { %s2762_s19 = scalar_select %p3270_p8, %s2423_s9, %s51_s1  }
  0xa5   : > { %p64_p2 = scmp.ne.s32.totalorder %s2419_s8, %s2415_s30  ;;  %s292_s17 = sand.u32 1, %s2423_s9  }
  0xa6   : > { %3271 = sst [smem:[#allocation34_spill]] %s2762_s19  ;;  %s1579_s2 = sshll.u32 %s2439_s13, 5 }
  0xa7   : > { %p3272_p13 = scmp.eq.s32.totalorder %s2443_s14, 0  ;;  %p3273_p5 = scmp.eq.s32.totalorder %s2572_s15, 0 }
  0xa8   : > { %s1517_s21 = sshll.u32 %s292_s17, 6  ;;  %s302_s3 = sadd.s32 %s2435_s12, %s1579_s2 }
  0xa9   : > { %p60_p3 = por %p3272_p13, %p58_p6  ;;  %p2774_p1 = por %p3273_p5, %p64_p2 }
  0xaa   : > { %s1520_s24 = sshll.u32 %s302_s3, 6  ;;  %s296_s4 = scalar_lea.vmem [#allocation3], %s1517_s21 }
  0xab   : > { %s305_s18 = sshll.u32 %s296_s4, 4  ;;  %s3275_s0 = sld [smem:[#allocation35_spill]]  ;;  %s2784_s18 = int_to_ptr.vmem [resolvable:$true] %s305_s18 }
  0xac   : > { %p3276_p7 = scmp.lt.s32.totalorder %s2443_s14, 4  ;;  %s2792_s7 = scalar_lea.sflag [#allocation4], %s292_s17 }
  0xae   : > { %p2788_p11 = pnand %p3276_p7, %p60_p3 }
  0xb0   : > { %p2189_p9 = pneg %p2788_p11 }
  0xb1   : > { %s2782_s16 = scalar_lea.hbm %s3275_s0, %s1520_s24  ;;  %s2192_s3 = scalar_lea.hbm %s3275_s0, 4096 }
  0xb2   : > { %s2187_s1 = scalar_lea.hbm %s2782_s16, 1024  ;;  %p2193_p0 = scmp.lt.u32.totalorder %s2782_s16, %s3275_s0 }
  0xb3   : > { %p2188_p4 = scmp.ne.s32.totalorder %s2782_s16, %s2187_s1  ;;  %p2194_p8 = scmp.lt.u32.totalorder %s2192_s3, %s2187_s1 }
  0xb4   : > { %p2196_p2 = scmp.lt.u32.totalorder %s2187_s1, %s2782_s16 }
  0xb5   : > { %p2190_p10 = pnand %p2189_p9, %p2188_p4  ;;  %p2195_p6 = por %p2194_p8, %p2193_p0 }
  0xb7   : > { %p2191_p12 = pneg %p2190_p10  ;;  %p2197_p13 = por %p2196_p2, %p2195_p6 }
  0xb9   : > { %p2198_p3 = pnand %p2197_p13, %p2191_p12 }
  0xbb   : > { %2201 = shalt.err (!%p2198_p3)
}
  0xbc   : > { %s2202_s17 = scalar_lea.vmem %s2784_s18, 1024  ;;  %s2451_s5 = smov [#allocation3]  }
  0xbd   : > { %p2203_p5 = scmp.ne.s32.totalorder %s2784_s18, %s2202_s17  ;;  %s2207_s27 = sshll.u32 %s2451_s5, 4  ;;  %s2208_s27 = int_to_ptr.vmem [resolvable:$false] %s2207_s27 }
  0xbe   : > { %s2209_s2 = scalar_lea.vmem %s2208_s27, 2048  ;;  %p2210_p10 = scmp.lt.s32.totalorder %s2784_s18, %s2208_s27 }
  0xbf   : > { %p2205_p7 = pnand %p2203_p5, %p2189_p9  ;;  %p2211_p0 = scmp.lt.s32.totalorder %s2209_s2, %s2202_s17 }
  0xc1   : > { %p2206_p4 = pneg %p2205_p7  ;;  %p2212_p8 = por %p2211_p0, %p2210_p10 }
  0xc3   : > { %p2213_p6 = pnand %p2212_p8, %p2206_p4 }
  0xc5   : > { %2216 = shalt.err (!%p2213_p6)
}
  0xc6   : > { %s2452_s1 = smov 64   ;;  %s3278_s21 = sld [smem:[#allocation24_spill]] }
  0xc7   : > { %s3279_s3 = sld [smem:[#allocation23_spill]]  ;;  %s2453_s24 = smov 4  }
  0xc8   : > { %1926 = dma.hbm_to_vmem [thread:$0]  (!%p2788_p11), %s2782_s16, 1024, %s2784_s18, %s2792_s7, %s3267_s11, %s2452_s1, %s2453_s24  }
  0xc9   : > { %s1511_s4 = sadd.s32 4294967294, %s2443_s14   ;;  %s103_s17 = sadd.s32 1, %s2399_s26 }
  0xca   : > { %p3280_p9 = scmp.eq.s32.totalorder %s2671_s20, 0  ;;  %p235_p13 = scmp.eq.s32.totalorder %s1511_s4, 3 }
  0xcb   : > { %s338_s27 = sand.u32 1, %s2399_s26   ;;  %p3281_p3 = scmp.eq.s32.totalorder %s2443_s14, 0 }
  0xcc   : > { %s2826_s5 = scalar_select %p3280_p9, %s2399_s26, %s103_s17  }
  0xcd   : > { %p110_p12 = scmp.ne.s32.totalorder %s2399_s26, %s3278_s21  ;;  %p116_p2 = scmp.ne.s32.totalorder %s3278_s21, %s3279_s3 }
  0xce   : > { %p3282_p7 = scmp.eq.s32.totalorder %s2572_s15, 0  ;;  %p3284_p10 = scmp.eq.s32.totalorder %s2572_s15, 3 }
  0xcf   : > { %p112_p5 = por %p110_p12, %p3281_p3  ;;  %p2847_p11 = por %p235_p13, %p116_p2 }
  0xd0   : > { %p2837_p4 = por %p116_p2, %p3282_p7  ;;  %p2843_p0 = por %p3284_p10, %p110_p12 }
  0xd1   : > { %s3286_s20 = scalar_select %p2847_p11, 1, 0 }
  0xd2   : > { %s3283_s2 = scalar_select %p2837_p4, 1, 0 }
  0xd3   : > { %s3285_s18 = scalar_select %p2843_p0, 1, 0 }
  0xd4   : > { %s2851_s16 = sshll.u32 %s338_s27, 7  ;;  %s1581_s30 = sshll.u32 %s2439_s13, 11 }
  0xd5   : > { %s3287_s21 = sld [smem:[#allocation37_spill]]  ;;  %s340_s24 = scalar_lea.vmem [#allocation8], %s2851_s16 }
  0xd6   : > { %s347_s4 = sshll.u32 %s340_s24, 4  ;;  %p3288_p8 = scmp.lt.s32.totalorder %s2443_s14, 4  ;;  %s2866_s4 = int_to_ptr.vmem [resolvable:$true] %s347_s4 }
  0xd7   : > { %s3290_s7 = sld [smem:[#allocation38_spill]] }
  0xd8   : > { %p2862_p6 = pnand %p3288_p8, %p112_p5 }
  0xda   : > { %p2219_p12 = pneg %p2862_p6 }
  0xdb   : > { %s2857_s3 = scalar_lea.hbm %s3287_s21, %s1581_s30  ;;  %s2222_s12 = scalar_lea.hbm %s3287_s21, 4096 }
  0xdc   : > { %s2217_s6 = scalar_lea.hbm %s2857_s3, 2048  ;;  %p2223_p3 = scmp.lt.u32.totalorder %s2857_s3, %s3287_s21 }
  0xdd   : > { %s2871_s1 = scalar_lea.hbm %s3290_s7, %s1581_s30  ;;  %p2218_p9 = scmp.ne.s32.totalorder %s2857_s3, %s2217_s6 }
  0xde   : > { %p2224_p5 = scmp.lt.u32.totalorder %s2222_s12, %s2217_s6  ;;  %p2226_p10 = scmp.lt.u32.totalorder %s2217_s6, %s2857_s3 }
  0xdf   : > { %p2220_p2 = pnand %p2219_p12, %p2218_p9 }
  0xe0   : > { %p2225_p7 = por %p2224_p5, %p2223_p3 }
  0xe1   : > { %p2221_p13 = pneg %p2220_p2 }
  0xe2   : > { %p2227_p8 = por %p2226_p10, %p2225_p7 }
  0xe4   : > { %p2228_p11 = pnand %p2227_p8, %p2221_p13 }
  0xe6   : > { %2231 = shalt.err (!%p2228_p11)
}
  0xe7   : > { %s2232_s0 = scalar_lea.vmem %s2866_s4, 2048  ;;  %s2454_s13 = smov [#allocation8]  }
  0xe8   : > { %p2233_p9 = scmp.ne.s32.totalorder %s2866_s4, %s2232_s0  ;;  %s2237_s30 = sshll.u32 %s2454_s13, 4  ;;  %s2238_s30 = int_to_ptr.vmem [resolvable:$false] %s2237_s30 }
  0xe9   : > { %s2239_s9 = scalar_lea.vmem %s2238_s30, 4096  ;;  %p2240_p4 = scmp.lt.s32.totalorder %s2866_s4, %s2238_s30 }
  0xea   : > { %p2235_p2 = pnand %p2233_p9, %p2219_p12  ;;  %p2241_p3 = scmp.lt.s32.totalorder %s2239_s9, %s2232_s0 }
  0xec   : > { %p2236_p0 = pneg %p2235_p2  ;;  %p2242_p5 = por %p2241_p3, %p2240_p4 }
  0xee   : > { %p2243_p7 = pnand %p2242_p5, %p2236_p0 }
  0xf0   : > { %2246 = shalt.err (!%p2243_p7)
}
  0xf1   : > { %1932 = dma.hbm_to_vmem [thread:$0]  (!%p2862_p6), %s2857_s3, 2048, %s2866_s4, %s2708_s10, %s3267_s11, %s3267_s11, %s3266_s23  }
  0xf2   : > { %s361_s6 = scalar_lea.vmem [#allocation9], %s2851_s16  ;;  %s3291_s19 = sand.u32 1, %s2443_s14  }
  0xf3   : > { %s368_s12 = sshll.u32 %s361_s6, 4  ;;  %s2907_s27 = scalar_lea.sflag [#allocation10], %s3291_s19  ;;  %s2903_s12 = int_to_ptr.vmem [resolvable:$true] %s368_s12 }
  0xf4   : > { %s2247_s24 = scalar_lea.hbm %s2871_s1, 2048  ;;  %s2252_s30 = scalar_lea.hbm %s3290_s7, 4096 }
  0xf5   : > { %p2248_p4 = scmp.ne.s32.totalorder %s2871_s1, %s2247_s24  ;;  %p2253_p13 = scmp.lt.u32.totalorder %s2871_s1, %s3290_s7 }
  0xf6   : > { %p2254_p10 = scmp.lt.u32.totalorder %s2252_s30, %s2247_s24  ;;  %p2256_p9 = scmp.lt.u32.totalorder %s2247_s24, %s2871_s1 }
  0xf7   : > { %p2250_p0 = pnand %p2248_p4, %p2219_p12 }
  0xf8   : > { %p2255_p8 = por %p2254_p10, %p2253_p13 }
  0xf9   : > { %p2251_p11 = pneg %p2250_p0 }
  0xfa   : > { %p2257_p2 = por %p2256_p9, %p2255_p8 }
  0xfc   : > { %p2258_p3 = pnand %p2257_p2, %p2251_p11 }
  0xfe   : > { %2261 = shalt.err (!%p2258_p3)
}
  0xff   : > { %s2262_s10 = scalar_lea.vmem %s2903_s12, 2048  ;;  %s2455_s16 = smov [#allocation9]  }
 0x100   : > { %p2263_p5 = scmp.ne.s32.totalorder %s2903_s12, %s2262_s10  ;;  %s2267_s3 = sshll.u32 %s2455_s16, 4  ;;  %s2268_s3 = int_to_ptr.vmem [resolvable:$false] %s2267_s3 }
 0x101   : > { %s2269_s21 = scalar_lea.vmem %s2268_s3, 4096  ;;  %p2270_p0 = scmp.lt.s32.totalorder %s2903_s12, %s2268_s3 }
 0x102   : > { %p2265_p7 = pnand %p2263_p5, %p2219_p12  ;;  %p2271_p13 = scmp.lt.s32.totalorder %s2269_s21, %s2262_s10 }
 0x104   : > { %p2266_p4 = pneg %p2265_p7  ;;  %p2272_p10 = por %p2271_p13, %p2270_p0 }
 0x106   : > { %p2273_p8 = pnand %p2272_p10, %p2266_p4 }
 0x108   : > { %2276 = shalt.err (!%p2273_p8)
}
 0x109   : > { %1935 = dma.hbm_to_vmem [thread:$0]  (!%p2862_p6), %s2871_s1, 2048, %s2903_s12, %s2907_s27, %s3267_s11, %s3267_s11, %s3266_s23  }
 0x10a   : > { %s3292_s4 = sld [smem:[#allocation30_spill]] }
 0x110   : > { %p3293_p12 = scmp.ne.s32.totalorder %s3292_s4, 0 }
 0x111   : > { %s382_s6 = sand.u32 (!%p3293_p12), 1, %s2419_s8  }
 0x112   : > { %380 = sbr.rel (%p3293_p12) target bundleno = 962 (0x3c2), region = 48  ;;  %s1531_s19 = sshll.u32 (!%p3293_p12), %s382_s6, 6 }
 0x113   : > { %s383_s24 = scalar_lea.sflag (!%p3293_p12), [#allocation4], %s382_s6  ;;  %s2939_s0 = scalar_lea.vmem (!%p3293_p12), [#allocation3], %s1531_s19 }
 0x119   : > { %2362 = dma.done.wait (%p2774_p1), %s383_s24, 1024  }
 0x11a   : > { %2364 = vsyncadd (%p2774_p1), %s383_s24, 4294966272  ;;  %s391_s17 = sand.u32 1, %s2572_s15   ;;  %s393_s23 = sand.u32 1, %s2407_s28  }
 0x11b   : > { %s1532_s11 = sshll.u32 %s393_s23, 7  ;;  %s392_s1 = scalar_lea.sflag [#allocation7], %s391_s17 }
 0x11c   : > { %s2947_s12 = scalar_lea.vmem [#allocation6], %s1532_s11  ;;  %p3294_p6 = scmp.ne.s32.totalorder %s3262_s22, 0 }
 0x11e   : > { %2366 = dma.done.wait (%p3294_p6), %s392_s1, 2048  }
 0x11f   : > { %2368 = vsyncadd (%p3294_p6), %s392_s1, 4294965248  ;;  %s3295_s27 = sld [smem:[#allocation24_spill]]  ;;  %p3296_p1 = scmp.ne.s32.totalorder %s3283_s2, 0 }
 0x125   : > { %s402_s13 = sand.u32 1, %s3295_s27  }
 0x126   : > { %s1533_s25 = sshll.u32 %s402_s13, 7 }
 0x127   : > { %s2956_s30 = scalar_lea.vmem [#allocation8], %s1533_s25 }
 0x128   : > { %2370 = dma.done.wait (%p3296_p1), %s392_s1, 2048  }
 0x129   : > { %2372 = vsyncadd (%p3296_p1), %s392_s1, 4294965248  ;;  %s410_s9 = scalar_lea.sflag [#allocation10], %s391_s17  ;;  %s2962_s10 = scalar_lea.vmem [#allocation9], %s1533_s25 }
 0x12a   : > { %2374 = dma.done.wait (%p3296_p1), %s410_s9, 2048  }
 0x12b   : > { %2376 = vsyncadd (%p3296_p1), %s410_s9, 4294965248  ;;  %p3297_p11 = scmp.eq.s32.totalorder %s2572_s15, 0 }
 0x12d   : > { %2378 = dma.done.wait (%p3297_p11), [#allocation10], 256   ;;  %p3298_p9 = pmov %p3297_p11 }
 0x12f   : > { %2380 = vsyncadd (%p3298_p9), [#allocation10], 4294967040  ;;  %p3299_p2 = pmov %p3298_p9 }
 0x131   : > { %2382 = dma.done.wait (%p3299_p2), [#allocation13], 272   ;;  %p3300_p3 = pmov %p3299_p2 }
 0x132   : > { %s2976_s22 = scalar_lea.vmem [#allocation15], %s1533_s25  ;;  %s3301_s16 = sld [smem:[#allocation26_spill]] }
 0x133   : > { %2384 = vsyncadd (%p3300_p3), [#allocation13], 4294967024 }
 0x138   : > { %p1539_p5 = scmp.ne.s32.totalorder %s3301_s16, 0 }
 0x139   : > { %vm480_vm0 = vcmask (!%p1539_p5), 130048   ;;  %v2456_v0 = vmov (!%p1539_p5), 0.0  }
 0x13a   : > { %479 = sbr.rel (%p1539_p5) target bundleno = 322 (0x142), region = 80  ;;  %481 = vst.msk [vmem:[#allocation2] sm:$0xff] (!%p1539_p5), %vm480_vm0, %v2456_v0  ;;  %482 = vst.msk [vmem:[#allocation2 + $0x8] sm:$0xff] (!%p1539_p5), %vm480_vm0, %v2456_v0 }
 0x13b   : > { %483 = vst.msk [vmem:[#allocation2 + $0x10] sm:$0xff] (!%p1539_p5), %vm480_vm0, %v2456_v0  ;;  %484 = vst.msk [vmem:[#allocation2 + $0x18] sm:$0xff] (!%p1539_p5), %vm480_vm0, %v2456_v0 }
 0x13c   : > { %485 = vst.msk [vmem:[#allocation2 + $0x20] sm:$0xff] (!%p1539_p5), %vm480_vm0, %v2456_v0  ;;  %486 = vst.msk [vmem:[#allocation2 + $0x28] sm:$0xff] (!%p1539_p5), %vm480_vm0, %v2456_v0 }
 0x13d   : > { %487 = vst.msk [vmem:[#allocation2 + $0x30] sm:$0xff] (!%p1539_p5), %vm480_vm0, %v2456_v0  ;;  %488 = vst.msk [vmem:[#allocation2 + $0x38] sm:$0xff] (!%p1539_p5), %vm480_vm0, %v2456_v0 }
 0x13e   : > { %489 = vst.msk [vmem:[#allocation2 + $0x40] sm:$0xff] (!%p1539_p5), %vm480_vm0, %v2456_v0  ;;  %490 = vst.msk [vmem:[#allocation2 + $0x48] sm:$0xff] (!%p1539_p5), %vm480_vm0, %v2456_v0 }
 0x13f   : > { %491 = vst.msk [vmem:[#allocation2 + $0x50] sm:$0xff] (!%p1539_p5), %vm480_vm0, %v2456_v0  ;;  %492 = vst.msk [vmem:[#allocation2 + $0x58] sm:$0xff] (!%p1539_p5), %vm480_vm0, %v2456_v0 }
 0x140   : > { %493 = vst.msk [vmem:[#allocation2 + $0x60] sm:$0xff] (!%p1539_p5), %vm480_vm0, %v2456_v0  ;;  %494 = vst.msk [vmem:[#allocation2 + $0x68] sm:$0xff] (!%p1539_p5), %vm480_vm0, %v2456_v0 }
 0x141   : > { %495 = vst.msk [vmem:[#allocation2 + $0x70] sm:$0xff] %vm480_vm0, %v2456_v0  ;;  %496 = vst.msk [vmem:[#allocation2 + $0x78] sm:$0xff] %vm480_vm0, %v2456_v0 }
 0x142 PF: > { %v545_v1 = vld [vmem:[%s2947_s12] sm:$0xff]  ;;  %v546_v2 = vld [vmem:[%s2947_s12 + $0x8] sm:$0xff]  ;;  %v547_v3 = vld [vmem:[%s2947_s12 + $0x10] sm:$0xff]  ;;  %vm722_vm1 = vcmask 130048   ;;  %s3302_s15 = sld [smem:[#allocation26_spill]] }
 0x143   : > { %v1803_v4 = vpack.c.bf16 %v546_v2, %v545_v1  ;;  %v548_v5 = vld [vmem:[%s2947_s12 + $0x18] sm:$0xff]  ;;  %v549_v7 = vld [vmem:[%s2947_s12 + $0x20] sm:$0xff]  ;;  %v550_v8 = vld [vmem:[%s2947_s12 + $0x28] sm:$0xff] }
 0x144   : > { %v1807_v6 = vpack.c.bf16 %v548_v5, %v547_v3  ;;  %v1811_v9 = vpack.c.bf16 %v550_v8, %v549_v7  ;;  %v1585_v10 = vld [vmem:[%s2939_s0] sm:$0xff]   ;;  %v551_v12 = vld [vmem:[%s2947_s12 + $0x30] sm:$0xff]  ;;  %v552_v13 = vld [vmem:[%s2947_s12 + $0x38] sm:$0xff] }
 0x145   : > { %1804 = vmatprep.subr.bf16.mxu0 %v1803_v4  ;;  %1843 = vmatprep.subr.bf16.mxu1 %v1803_v4  ;;  %v1619_v11 = vld [vmem:[%s2939_s0 + $0x20] sm:$0xff]   ;;  %v1586_v14 = vunpack.c.l.bf16 %v1585_v10  ;;  %v1815_v16 = vpack.c.bf16 %v552_v13, %v551_v12  ;;  %v554_v18 = vld [vmem:[%s2947_s12 + $0x48] sm:$0xff]  ;;  %v555_v20 = vld [vmem:[%s2947_s12 + $0x50] sm:$0xff]  ;;  %v1587_v31 = vunpack.c.h.bf16 %v1585_v10 }
 0x146   : > { %1806 = vmatpush3.bf16.msra.mxu0 %v1803_v4  ;;  %1851 = vmatpush3.bf16.msra.mxu1 %v1803_v4  ;;  %v1602_v15 = vunpack.c.l.bf16 %v1619_v11  ;;  %v553_v17 = vld [vmem:[%s2947_s12 + $0x40] sm:$0xff]  ;;  %v556_v21 = vld [vmem:[%s2947_s12 + $0x58] sm:$0xff]  ;;  %v558_v24 = vld [vmem:[%s2947_s12 + $0x68] sm:$0xff]  ;;  %v1603_v32 = vunpack.c.h.bf16 %v1619_v11 }
 0x147   : > { %1808 = vmatprep.subr.bf16.mxu0 %v1807_v6  ;;  %1844 = vmatprep.subr.bf16.mxu1 %v1807_v6  ;;  %v1819_v19 = vpack.c.bf16 %v554_v18, %v553_v17  ;;  %v1823_v22 = vpack.c.bf16 %v556_v21, %v555_v20  ;;  %v557_v23 = vld [vmem:[%s2947_s12 + $0x60] sm:$0xff]  ;;  %v559_v26 = vld [vmem:[%s2947_s12 + $0x70] sm:$0xff]  ;;  %v560_v27 = vld [vmem:[%s2947_s12 + $0x78] sm:$0xff] }
 0x148   : > { %1723 = vmatprep.mubr.f32.mxu0 %v1586_v14  ;;  %1735 = vmatprep.mubr.f32.mxu1 %v1602_v15  ;;  %v1827_v25 = vpack.c.bf16 %v558_v24, %v557_v23  ;;  %v1831_v28 = vpack.c.bf16 %v560_v27, %v559_v26  ;;  %v1616_v29 = vld [vmem:[%s2939_s0 + $0x8] sm:$0xff]   ;;  %v1617_v35 = vld [vmem:[%s2939_s0 + $0x10] sm:$0xff]   ;;  %v1618_v41 = vld [vmem:[%s2939_s0 + $0x18] sm:$0xff]   ;;  %p1540_p7 = scmp.ne.s32.totalorder %s3302_s15, 1 }
 0x149   : > { %v1620_v30 = vld [vmem:[%s2939_s0 + $0x28] sm:$0xff]   ;;  %v1590_v33 = vunpack.c.l.bf16 %v1616_v29  ;;  %v1621_v36 = vld [vmem:[%s2939_s0 + $0x30] sm:$0xff]   ;;  %v1591_v37 = vunpack.c.h.bf16 %v1616_v29  ;;  %v1594_v39 = vunpack.c.l.bf16 %v1617_v35  ;;  %v1622_v42 = vld [vmem:[%s2939_s0 + $0x38] sm:$0xff]   ;;  %v1595_v43 = vunpack.c.h.bf16 %v1617_v35 }
 0x14a   : > { %1810 = vmatpush3.bf16.msra.mxu0 %v1807_v6  ;;  %1852 = vmatpush3.bf16.msra.mxu1 %v1807_v6  ;;  %v1606_v34 = vunpack.c.l.bf16 %v1620_v30  ;;  %v1607_v38 = vunpack.c.h.bf16 %v1620_v30  ;;  %v1610_v40 = vunpack.c.l.bf16 %v1621_v36  ;;  %v1611_v44 = vunpack.c.h.bf16 %v1621_v36  ;;  %v498_v49 = vld [vmem:[#allocation2 + $0x8] sm:$0xff]  ;;  %v497_v51 = vld [vmem:[#allocation2] sm:$0xff]  ;;  %v500_v61 = vld [vmem:[#allocation2 + $0x18] sm:$0xff] }
 0x14b   : > { %1812 = vmatprep.subr.bf16.mxu0 %v1811_v9  ;;  %1845 = vmatprep.subr.bf16.mxu1 %v1811_v9  ;;  %v1598_v45 = vunpack.c.l.bf16 %v1618_v41  ;;  %v1614_v46 = vunpack.c.l.bf16 %v1622_v42  ;;  %v1599_v47 = vunpack.c.h.bf16 %v1618_v41  ;;  %v1615_v48 = vunpack.c.h.bf16 %v1622_v42  ;;  %v506_v50 = vld [vmem:[#allocation2 + $0x48] sm:$0xff]  ;;  %v505_v52 = vld [vmem:[#allocation2 + $0x40] sm:$0xff]  ;;  %v508_v62 = vld [vmem:[#allocation2 + $0x58] sm:$0xff] }
 0x14c   : > { %v499_v63 = vld [vmem:[#allocation2 + $0x10] sm:$0xff]  ;;  %v510_v10 = vld [vmem:[#allocation2 + $0x68] sm:$0xff]  ;;  %v501_v11 = vld [vmem:[#allocation2 + $0x20] sm:$0xff]  ;;  %v2457_v35 = vmov (!%p1540_p7), 0  }
 0x14d   : > { %v507_v0 = vld [vmem:[#allocation2 + $0x50] sm:$0xff]  ;;  %v509_v12 = vld [vmem:[#allocation2 + $0x60] sm:$0xff]  ;;  %v504_v21 = vld [vmem:[#allocation2 + $0x38] sm:$0xff]  ;;  %2072 = vset.pattern.permute.xlu1 (!%p1540_p7), %v2457_v35  ;;  %2071 = vset.pattern.permute.xlu0 (!%p1540_p7), %v2457_v35 }
 0x14e   : > { %1814 = vmatpush3.bf16.msra.mxu0 %v1811_v9  ;;  %1853 = vmatpush3.bf16.msra.mxu1 %v1811_v9  ;;  %v502_v9 = vld [vmem:[#allocation2 + $0x28] sm:$0xff]  ;;  %v503_v23 = vld [vmem:[#allocation2 + $0x30] sm:$0xff]  ;;  %v762_v36 = vld [vmem:[%s2962_s10 + $0x18] sm:$0xff] (!%p1540_p7) }
 0x14f   : > { %1816 = vmatprep.subr.bf16.mxu0 %v1815_v16  ;;  %1846 = vmatprep.subr.bf16.mxu1 %v1815_v16  ;;  %v511_v24 = vld [vmem:[#allocation2 + $0x70] sm:$0xff]  ;;  %v873_v41 = vld [vmem:[%s2956_s30] sm:$0xff] (!%p1540_p7) }
 0x150   : > { %v871_v42 = vld [vmem:[#allocation11] sm:$0xff] (!%p1540_p7) }
 0x152   : > { %1818 = vmatpush3.bf16.msra.mxu0 %v1815_v16  ;;  %1854 = vmatpush3.bf16.msra.mxu1 %v1815_v16 }
 0x153   : > { %1820 = vmatprep.subr.bf16.mxu0 %v1819_v19  ;;  %1847 = vmatprep.subr.bf16.mxu1 %v1819_v19 }
 0x156   : > { %1822 = vmatpush3.bf16.msra.mxu0 %v1819_v19  ;;  %1855 = vmatpush3.bf16.msra.mxu1 %v1819_v19 }
 0x157   : > { %1824 = vmatprep.subr.bf16.mxu0 %v1823_v22  ;;  %1848 = vmatprep.subr.bf16.mxu1 %v1823_v22 }
 0x15a   : > { %1826 = vmatpush3.bf16.msra.mxu0 %v1823_v22  ;;  %1856 = vmatpush3.bf16.msra.mxu1 %v1823_v22  ;;  %v512_v22 = vld [vmem:[#allocation2 + $0x78] sm:$0xff] }
 0x15b   : > { %1828 = vmatprep.subr.bf16.mxu0 %v1827_v25  ;;  %1849 = vmatprep.subr.bf16.mxu1 %v1827_v25 }
 0x15e   : > { %1830 = vmatpush3.bf16.msra.mxu0 %v1827_v25  ;;  %1857 = vmatpush3.bf16.msra.mxu1 %v1827_v25 }
 0x15f   : > { %1832 = vmatprep.subr.bf16.mxu0 %v1831_v28  ;;  %1850 = vmatprep.subr.bf16.mxu1 %v1831_v28 }
 0x162   : > { %1834 = vmatpush3.bf16.msra.mxu0 %v1831_v28  ;;  %1858 = vmatpush3.bf16.msra.mxu1 %v1831_v28 }
 0x165   : > { %1724 = vmatmul.mubr.f32.vlgmr.msra.gmra.mrb[0].mxu0 %v1587_v31  ;;  %1736 = vmatmul.mubr.f32.vlgmr.msra.gmra.mrb[0].mxu1 %v1603_v32 }
 0x166   : > { %1726 = vmatprep.mubr.f32.mxu0 %v1590_v33  ;;  %1738 = vmatprep.mubr.f32.mxu1 %v1606_v34  ;;  %v761_v33 = vld [vmem:[%s2962_s10 + $0x10] sm:$0xff] (!%p1540_p7)  ;;  %v759_v34 = vld [vmem:[%s2962_s10] sm:$0xff] (!%p1540_p7) }
 0x167   : > { %787 = vperm.xlu1 (!%p1540_p7), %2072, %v761_v33   ;;  %777 = vperm.xlu0 (!%p1540_p7), %2071, %v759_v34  }
 0x169   : > { %1727 = vmatmul.mubr.f32.gmra.mrb[2].mxu0 %v1591_v37  ;;  %1739 = vmatmul.mubr.f32.gmra.mrb[2].mxu1 %v1607_v38  ;;  %v760_v37 = vld [vmem:[%s2962_s10 + $0x8] sm:$0xff] (!%p1540_p7)  ;;  %v889_v38 = vld [vmem:[#allocation12] sm:$0xff] (!%p1540_p7) }
 0x16a   : > { %1729 = vmatprep.mubr.f32.mxu0 %v1594_v39  ;;  %1741 = vmatprep.mubr.f32.mxu1 %v1610_v40  ;;  %v890_v39 = vld [vmem:[#allocation12 + $0x8] sm:$0xff] (!%p1540_p7) }
 0x16b   : > { %792 = vperm.xlu1 (!%p1540_p7), %2072, %v762_v36   ;;  %782 = vperm.xlu0 (!%p1540_p7), %2071, %v760_v37   ;;  %v1835_v40 = vpack.c.bf16 (!%p1540_p7), %v890_v39, %v889_v38 }
 0x16d   : > { %1730 = vmatmul.mubr.f32.gmra.mrb[4].mxu0 %v1595_v43  ;;  %1742 = vmatmul.mubr.f32.gmra.mrb[4].mxu1 %v1611_v44  ;;  %v764_v43 = vld [vmem:[%s2962_s10 + $0x28] sm:$0xff] (!%p1540_p7)  ;;  %v763_v44 = vld [vmem:[%s2962_s10 + $0x20] sm:$0xff] (!%p1540_p7) }
 0x16e   : > { %1732 = vmatprep.mubr.f32.mxu0 %v1598_v45  ;;  %1744 = vmatprep.mubr.f32.mxu1 %v1614_v46  ;;  %v872_v45 = vld [vmem:[#allocation11 + $0x8] sm:$0xff] (!%p1540_p7) }
 0x16f   : > { %1836 = vmatprep.subr.bf16.mxu1 (!%p1540_p7), %v1835_v40  ;;  %v1839_v46 = vpack.c.bf16 (!%p1540_p7), %v872_v45, %v871_v42  ;;  %802 = vperm.xlu1 (!%p1540_p7), %2072, %v764_v43  }
 0x170   : > { %1838 = vmatpush3.bf16.msra.mxu1 (!%p1540_p7), %v1835_v40  ;;  %797 = vperm.xlu0 (!%p1540_p7), %2071, %v763_v44  }
 0x171   : > { %1733 = vmatmul.mubr.f32.gmra.mrb[6].mxu0 %v1599_v47  ;;  %1745 = vmatmul.mubr.f32.gmra.mrb[6].mxu1 %v1615_v48  ;;  %v874_v47 = vld [vmem:[%s2956_s30 + $0x8] sm:$0xff] (!%p1540_p7)  ;;  %v875_v48 = vld [vmem:[%s2956_s30 + $0x10] sm:$0xff] (!%p1540_p7) }
 0x172   : > { %1751 = vmatprep.mubr.msk.f32.mxu1 (!%p1540_p7), %vm722_vm1, %v873_v41  ;;  %1840 = vmatprep.subr.bf16.mxu0 (!%p1540_p7), %v1839_v46 }
 0x173   : > { %1842 = vmatpush3.bf16.msra.mxu0 (!%p1540_p7), %v1839_v46 }
 0x238   : > { %v1725_v53 = vpop.f32.mrb[0].mxu0  ;;  %v1737_v54 = vpop.f32.mrb[0].mxu1 }
 0x239   : > { %v707_v55 = vadd.f32 %v1725_v53, %v498_v49  ;;  %v715_v56 = vadd.f32 %v1737_v54, %v506_v50  ;;  %v627_v57 = vpop.f32.mrb[1].mxu0  ;;  %v667_v58 = vpop.f32.mrb[1].mxu1  ;;  %v766_v49 = vld [vmem:[%s2962_s10 + $0x38] sm:$0xff] (!%p1540_p7)  ;;  %v765_v50 = vld [vmem:[%s2962_s10 + $0x30] sm:$0xff] (!%p1540_p7)  ;;  %1752 = vmatmul.mubr.msk.f32.vlgmr.msra.gmra.mrb[0].mxu1 (!%p1540_p7), %vm722_vm1, %v874_v47  ;;  %v768_v53 = vld [vmem:[%s2962_s10 + $0x48] sm:$0xff] (!%p1540_p7) }
 0x23a   : > { %v706_v59 = vadd.f32 %v627_v57, %v497_v51  ;;  %v714_v60 = vadd.f32 %v667_v58, %v505_v52  ;;  %1754 = vmatprep.mubr.msk.f32.mxu1 (!%p1540_p7), %vm722_vm1, %v875_v48  ;;  %v876_v51 = vld [vmem:[%s2956_s30 + $0x18] sm:$0xff] (!%p1540_p7)  ;;  %812 = vperm.xlu1 (!%p1540_p7), %2072, %v766_v49   ;;  %v877_v52 = vld [vmem:[%s2956_s30 + $0x20] sm:$0xff] (!%p1540_p7)  ;;  %v769_v58 = vld [vmem:[%s2962_s10 + $0x50] sm:$0xff] (!%p1540_p7) }
 0x23b   : > { %724 = vst.msk [vmem:[#allocation2 + $0x8] sm:$0xff] %vm722_vm1, %v707_v55  ;;  %732 = vst.msk [vmem:[#allocation2 + $0x48] sm:$0xff] %vm722_vm1, %v715_v56  ;;  %807 = vperm.xlu0 (!%p1540_p7), %2071, %v765_v50   ;;  %v767_v54 = vld [vmem:[%s2962_s10 + $0x40] sm:$0xff] (!%p1540_p7)  ;;  %v878_v55 = vld [vmem:[%s2956_s30 + $0x28] sm:$0xff] (!%p1540_p7) }
 0x23c   : > { %723 = vst.msk [vmem:[#allocation2] sm:$0xff] %vm722_vm1, %v706_v59  ;;  %731 = vst.msk [vmem:[#allocation2 + $0x40] sm:$0xff] %vm722_vm1, %v714_v60  ;;  %v1728_v1 = vpop.f32.mrb[2].mxu0  ;;  %v1740_v2 = vpop.f32.mrb[2].mxu1  ;;  %v879_v56 = vld [vmem:[%s2956_s30 + $0x30] sm:$0xff] (!%p1540_p7)  ;;  %v770_v57 = vld [vmem:[%s2962_s10 + $0x58] sm:$0xff] (!%p1540_p7) }
 0x23d   : > { %v709_v3 = vadd.f32 %v1728_v1, %v500_v61  ;;  %v717_v4 = vadd.f32 %v1740_v2, %v508_v62  ;;  %v637_v5 = vpop.f32.mrb[3].mxu0  ;;  %v677_v6 = vpop.f32.mrb[3].mxu1  ;;  %1755 = vmatmul.mubr.msk.f32.gmra.mrb[2].mxu1 (!%p1540_p7), %vm722_vm1, %v876_v51  ;;  %v880_v59 = vld [vmem:[%s2956_s30 + $0x38] sm:$0xff] (!%p1540_p7)  ;;  %v881_v60 = vld [vmem:[%s2956_s30 + $0x40] sm:$0xff] (!%p1540_p7)  ;;  %v772_v61 = vld [vmem:[%s2962_s10 + $0x68] sm:$0xff] (!%p1540_p7) }
 0x23e   : > { %v708_v7 = vadd.f32 %v637_v5, %v499_v63  ;;  %v716_v8 = vadd.f32 %v677_v6, %v507_v0  ;;  %1757 = vmatprep.mubr.msk.f32.mxu1 (!%p1540_p7), %vm722_vm1, %v877_v52  ;;  %822 = vperm.xlu1 (!%p1540_p7), %2072, %v768_v53   ;;  %v771_v62 = vld [vmem:[%s2962_s10 + $0x60] sm:$0xff] (!%p1540_p7)  ;;  %v882_v63 = vld [vmem:[%s2956_s30 + $0x48] sm:$0xff] (!%p1540_p7)  ;;  %v883_v0 = vld [vmem:[%s2956_s30 + $0x50] sm:$0xff] (!%p1540_p7) }
 0x23f   : > { %726 = vst.msk [vmem:[#allocation2 + $0x18] sm:$0xff] %vm722_vm1, %v709_v3  ;;  %734 = vst.msk [vmem:[#allocation2 + $0x58] sm:$0xff] %vm722_vm1, %v717_v4  ;;  %817 = vperm.xlu0 (!%p1540_p7), %2071, %v767_v54   ;;  %v774_v1 = vld [vmem:[%s2962_s10 + $0x78] sm:$0xff] (!%p1540_p7)  ;;  %v773_v2 = vld [vmem:[%s2962_s10 + $0x70] sm:$0xff] (!%p1540_p7) }
 0x240   : > { %725 = vst.msk [vmem:[#allocation2 + $0x10] sm:$0xff] %vm722_vm1, %v708_v7  ;;  %733 = vst.msk [vmem:[#allocation2 + $0x50] sm:$0xff] %vm722_vm1, %v716_v8  ;;  %v1731_v13 = vpop.f32.mrb[4].mxu0  ;;  %v1743_v14 = vpop.f32.mrb[4].mxu1  ;;  %v884_v3 = vld [vmem:[%s2956_s30 + $0x58] sm:$0xff] (!%p1540_p7)  ;;  %v885_v4 = vld [vmem:[%s2956_s30 + $0x60] sm:$0xff] (!%p1540_p7) }
 0x241   : > { %v711_v15 = vadd.f32 %v1731_v13, %v502_v9  ;;  %v719_v16 = vadd.f32 %v1743_v14, %v510_v10  ;;  %v647_v17 = vpop.f32.mrb[5].mxu0  ;;  %v687_v18 = vpop.f32.mrb[5].mxu1  ;;  %1758 = vmatmul.mubr.msk.f32.gmra.mrb[4].mxu1 (!%p1540_p7), %vm722_vm1, %v878_v55  ;;  %v886_v5 = vld [vmem:[%s2956_s30 + $0x68] sm:$0xff] (!%p1540_p7)  ;;  %v887_v6 = vld [vmem:[%s2956_s30 + $0x70] sm:$0xff] (!%p1540_p7)  ;;  %v888_v7 = vld [vmem:[%s2956_s30 + $0x78] sm:$0xff] (!%p1540_p7) }
 0x242   : > { %v710_v19 = vadd.f32 %v647_v17, %v501_v11  ;;  %v718_v20 = vadd.f32 %v687_v18, %v509_v12  ;;  %742 = sbr.rel (%p1540_p7) target bundleno = 934 (0x3a6), region = 84  ;;  %1760 = vmatprep.mubr.msk.f32.mxu1 (!%p1540_p7), %vm722_vm1, %v879_v56  ;;  %832 = vperm.xlu1 (!%p1540_p7), %2072, %v770_v57   ;;  %v788_v9 = vpop.permute.xlu1 (!%p1540_p7), %787  ;;  %v778_v10 = vpop.permute.xlu0 (!%p1540_p7), %777  ;;  %v744_v13 = vld [vmem:[#allocation2 + $0x8] sm:$0xff] (!%p1540_p7) }
 0x243   : > { %728 = vst.msk [vmem:[#allocation2 + $0x28] sm:$0xff] %vm722_vm1, %v711_v15  ;;  %736 = vst.msk [vmem:[#allocation2 + $0x68] sm:$0xff] %vm722_vm1, %v719_v16  ;;  %827 = vperm.xlu0 (!%p1540_p7), %2071, %v769_v58   ;;  %v743_v8 = vld [vmem:[#allocation2] sm:$0xff] (!%p1540_p7)  ;;  %v752_v36 = vld [vmem:[#allocation2 + $0x48] sm:$0xff] (!%p1540_p7) }
 0x244   : > { %727 = vst.msk [vmem:[#allocation2 + $0x20] sm:$0xff] %vm722_vm1, %v710_v19  ;;  %735 = vst.msk [vmem:[#allocation2 + $0x60] sm:$0xff] %vm722_vm1, %v718_v20  ;;  %v1734_v25 = vpop.f32.mrb[6].mxu0  ;;  %v1746_v26 = vpop.f32.mrb[6].mxu1  ;;  %v855_v12 = vmul.f32 (!%p1540_p7), %v778_v10, %v743_v8  ;;  %v1557_v8 = vld [vmem:[#allocation14] ss:$0 sm:$0xff] (!%p1540_p7) }
 0x245   : > { %v713_v27 = vadd.f32 %v1734_v25, %v504_v21  ;;  %v721_v28 = vadd.f32 %v1746_v26, %v512_v22  ;;  %v657_v29 = vpop.f32.mrb[7].mxu0  ;;  %v697_v30 = vpop.f32.mrb[7].mxu1  ;;  %1761 = vmatmul.mubr.msk.f32.gmra.mrb[6].mxu1 (!%p1540_p7), %vm722_vm1, %v880_v59 }
 0x246   : > { %v712_v31 = vadd.f32 %v657_v29, %v503_v23  ;;  %v720_v32 = vadd.f32 %v697_v30, %v511_v24  ;;  %1763 = vmatprep.mubr.msk.f32.mxu1 (!%p1540_p7), %vm722_vm1, %v881_v60  ;;  %842 = vperm.xlu1 (!%p1540_p7), %2072, %v772_v61   ;;  %v793_v15 = vpop.permute.xlu1 (!%p1540_p7), %792  ;;  %v783_v16 = vpop.permute.xlu0 (!%p1540_p7), %782  ;;  %v746_v18 = vld [vmem:[#allocation2 + $0x18] sm:$0xff] (!%p1540_p7) }
 0x247   : > { %730 = vst.msk [vmem:[#allocation2 + $0x38] sm:$0xff] %vm722_vm1, %v713_v27  ;;  %738 = vst.msk [vmem:[#allocation2 + $0x78] sm:$0xff] %vm722_vm1, %v721_v28  ;;  %837 = vperm.xlu0 (!%p1540_p7), %2071, %v771_v62   ;;  %v745_v11 = vld [vmem:[#allocation2 + $0x10] sm:$0xff] (!%p1540_p7)  ;;  %1779 = vmatprep.mubr.msk.f32.mxu0 (!%p1540_p7), %vm722_vm1, %v855_v12  ;;  %v856_v17 = vmul.f32 (!%p1540_p7), %v783_v16, %v744_v13  ;;  %v858_v22 = vmul.f32 (!%p1540_p7), %v793_v15, %v746_v18  ;;  %v754_v42 = vld [vmem:[#allocation2 + $0x58] sm:$0xff] (!%p1540_p7) }
 0x248   : > { %729 = vst.msk [vmem:[#allocation2 + $0x30] sm:$0xff] %vm722_vm1, %v712_v31  ;;  %737 = vst.msk [vmem:[#allocation2 + $0x70] sm:$0xff] %vm722_vm1, %v720_v32  ;;  %v857_v14 = vmul.f32 (!%p1540_p7), %v788_v9, %v745_v11  ;;  %v751_v31 = vld [vmem:[#allocation2 + $0x40] sm:$0xff] (!%p1540_p7)  ;;  %v753_v37 = vld [vmem:[#allocation2 + $0x50] sm:$0xff] (!%p1540_p7) }
 0x249   : > { %1764 = vmatmul.mubr.msk.f32.gmra.mrb[8].mxu1 %vm722_vm1, %v882_v63  ;;  %1780 = vmatmul.mubr.msk.f32.vlgmr.msra.gmra.mrb[0].mxu0 %vm722_vm1, %v856_v17 }
 0x24a   : > { %1766 = vmatprep.mubr.msk.f32.mxu1 %vm722_vm1, %v883_v0  ;;  %852 = vperm.xlu1 %2072, %v774_v1   ;;  %v803_v20 = vpop.permute.xlu1 %802  ;;  %v798_v21 = vpop.permute.xlu0 %797  ;;  %v748_v24 = vld [vmem:[#allocation2 + $0x28] sm:$0xff] }
 0x24b   : > { %847 = vperm.xlu0 %2071, %v773_v2   ;;  %v747_v19 = vld [vmem:[#allocation2 + $0x20] sm:$0xff]  ;;  %1782 = vmatprep.mubr.msk.f32.mxu0 %vm722_vm1, %v857_v14  ;;  %v860_v28 = vmul.f32 %v803_v20, %v748_v24  ;;  %v756_v48 = vld [vmem:[#allocation2 + $0x68] sm:$0xff] }
 0x24c   : > { %v859_v23 = vmul.f32 %v798_v21, %v747_v19  ;;  %v755_v43 = vld [vmem:[#allocation2 + $0x60] sm:$0xff] }
 0x24d   : > { %1767 = vmatmul.mubr.msk.f32.gmra.mrb[10].mxu1 %vm722_vm1, %v884_v3  ;;  %1783 = vmatmul.mubr.msk.f32.gmra.mrb[2].mxu0 %vm722_vm1, %v858_v22 }
 0x24e   : > { %1769 = vmatprep.mubr.msk.f32.mxu1 %vm722_vm1, %v885_v4  ;;  %1785 = vmatprep.mubr.msk.f32.mxu0 %vm722_vm1, %v859_v23  ;;  %v750_v30 = vld [vmem:[#allocation2 + $0x38] sm:$0xff] }
 0x24f   : > { %v749_v25 = vld [vmem:[#allocation2 + $0x30] sm:$0xff]  ;;  %v758_v54 = vld [vmem:[#allocation2 + $0x78] sm:$0xff] }
 0x250   : > { %v757_v49 = vld [vmem:[#allocation2 + $0x70] sm:$0xff] }
 0x251   : > { %1770 = vmatmul.mubr.msk.f32.gmra.mrb[12].mxu1 %vm722_vm1, %v886_v5  ;;  %1786 = vmatmul.mubr.msk.f32.gmra.mrb[4].mxu0 %vm722_vm1, %v860_v28 }
 0x252   : > { %1772 = vmatprep.mubr.msk.f32.mxu1 %vm722_vm1, %v887_v6 }
 0x255   : > { %1773 = vmatmul.mubr.msk.f32.gmra.mrb[14].mxu1 %vm722_vm1, %v888_v7 }
 0x2b9   : > { %v813_v26 = vpop.permute.xlu1 %812 }
 0x2ba   : > { %v808_v27 = vpop.permute.xlu0 %807  ;;  %v862_v34 = vmul.f32 %v813_v26, %v750_v30 }
 0x2bb   : > { %v861_v29 = vmul.f32 %v808_v27, %v749_v25 }
 0x2bd   : > { %v823_v32 = vpop.permute.xlu1 %822  ;;  %1788 = vmatprep.mubr.msk.f32.mxu0 %vm722_vm1, %v861_v29 }
 0x2be   : > { %v818_v33 = vpop.permute.xlu0 %817  ;;  %1789 = vmatmul.mubr.msk.f32.gmra.mrb[6].mxu0 %vm722_vm1, %v862_v34  ;;  %v864_v40 = vmul.f32 %v823_v32, %v752_v36 }
 0x2bf   : > { %v863_v35 = vmul.f32 %v818_v33, %v751_v31 }
 0x2c1   : > { %v833_v38 = vpop.permute.xlu1 %832  ;;  %1791 = vmatprep.mubr.msk.f32.mxu0 %vm722_vm1, %v863_v35 }
 0x2c2   : > { %v828_v39 = vpop.permute.xlu0 %827  ;;  %1792 = vmatmul.mubr.msk.f32.gmra.mrb[8].mxu0 %vm722_vm1, %v864_v40  ;;  %v866_v46 = vmul.f32 %v833_v38, %v754_v42 }
 0x2c3   : > { %v865_v41 = vmul.f32 %v828_v39, %v753_v37 }
 0x2c5   : > { %v843_v44 = vpop.permute.xlu1 %842  ;;  %1794 = vmatprep.mubr.msk.f32.mxu0 %vm722_vm1, %v865_v41 }
 0x2c6   : > { %v838_v45 = vpop.permute.xlu0 %837  ;;  %1795 = vmatmul.mubr.msk.f32.gmra.mrb[10].mxu0 %vm722_vm1, %v866_v46  ;;  %v868_v51 = vmul.f32 %v843_v44, %v756_v48 }
 0x2c7   : > { %v867_v47 = vmul.f32 %v838_v45, %v755_v43 }
 0x2c9   : > { %1797 = vmatprep.mubr.msk.f32.mxu0 %vm722_vm1, %v867_v47  ;;  %v853_v53 = vpop.permute.xlu1 %852 }
 0x2ca   : > { %v848_v50 = vpop.permute.xlu0 %847  ;;  %1798 = vmatmul.mubr.msk.f32.gmra.mrb[12].mxu0 %vm722_vm1, %v868_v51  ;;  %v870_v55 = vmul.f32 %v853_v53, %v758_v54 }
 0x2cb   : > { %v869_v52 = vmul.f32 %v848_v50, %v757_v49 }
 0x2cd   : > { %1800 = vmatprep.mubr.msk.f32.mxu0 %vm722_vm1, %v869_v52 }
 0x2ce   : > { %1801 = vmatmul.mubr.msk.f32.gmra.mrb[14].mxu0 %vm722_vm1, %v870_v55 }
 0x30c   : > { %v1753_v56 = vpop.f32.mrb[0].mxu1 }
 0x30d   : > { %v1005_v57 = vpop.f32.mrb[1].mxu1 }
 0x310   : > { %v1756_v58 = vpop.f32.mrb[2].mxu1 }
 0x311   : > { %v1015_v59 = vpop.f32.mrb[3].mxu1  ;;  %v1863_v11 = vadd.f32 %v1756_v58, %v1557_v8 }
 0x312   : > { %v1865_v14 = vadd.f32 %v1557_v8, %v1015_v59 }
 0x314   : > { %v1759_v60 = vpop.f32.mrb[4].mxu1 }
 0x315   : > { %v1025_v61 = vpop.f32.mrb[5].mxu1  ;;  %v1867_v19 = vadd.f32 %v1759_v60, %v1557_v8 }
 0x316   : > { %v1869_v22 = vadd.f32 %v1557_v8, %v1025_v61 }
 0x318   : > { %v1762_v62 = vpop.f32.mrb[6].mxu1 }
 0x319   : > { %v1035_v63 = vpop.f32.mrb[7].mxu1  ;;  %v1871_v25 = vadd.f32 %v1762_v62, %v1557_v8 }
 0x31a   : > { %v1873_v28 = vadd.f32 %v1557_v8, %v1035_v63 }
 0x31c   : > { %v1765_v0 = vpop.f32.mrb[8].mxu1  ;;  %v1781_v9 = vpop.f32.mrb[0].mxu0 }
 0x31d   : > { %v1045_v1 = vpop.f32.mrb[9].mxu1  ;;  %v1859_v10 = vadd.f32 %v1781_v9, %v1753_v56  ;;  %v1205_v12 = vpop.f32.mrb[1].mxu0  ;;  %v1875_v31 = vadd.f32 %v1765_v0, %v1557_v8 }
 0x31e   : > { %v1861_v13 = vadd.f32 %v1205_v12, %v1005_v57  ;;  %v1877_v34 = vadd.f32 %v1557_v8, %v1045_v1 }
 0x31f   : > { %v1860_v15 = vadd.f32 %v1859_v10, %v1557_v8 }
 0x320   : > { %v1768_v2 = vpop.f32.mrb[10].mxu1  ;;  %v1862_v16 = vadd.f32 %v1861_v13, %v1557_v8  ;;  %v1784_v17 = vpop.f32.mrb[2].mxu0 }
 0x321   : > { %v1055_v3 = vpop.f32.mrb[11].mxu1  ;;  %1301 = vst [vmem:[%s2976_s22 + $0x8] sm:$0xff] %v1860_v15  ;;  %v1864_v18 = vadd.f32 %v1863_v11, %v1784_v17  ;;  %v1215_v20 = vpop.f32.mrb[3].mxu0  ;;  %v1879_v37 = vadd.f32 %v1768_v2, %v1557_v8 }
 0x322   : > { %1300 = vst [vmem:[%s2976_s22] sm:$0xff] %v1862_v16  ;;  %v1866_v21 = vadd.f32 %v1865_v14, %v1215_v20  ;;  %v1881_v40 = vadd.f32 %v1557_v8, %v1055_v3 }
 0x323   : > { %1303 = vst [vmem:[%s2976_s22 + $0x18] sm:$0xff] %v1864_v18 }
 0x324   : > { %v1771_v4 = vpop.f32.mrb[12].mxu1  ;;  %1302 = vst [vmem:[%s2976_s22 + $0x10] sm:$0xff] %v1866_v21  ;;  %v1787_v23 = vpop.f32.mrb[4].mxu0 }
 0x325   : > { %v1065_v5 = vpop.f32.mrb[13].mxu1  ;;  %v1868_v24 = vadd.f32 %v1867_v19, %v1787_v23  ;;  %v1225_v26 = vpop.f32.mrb[5].mxu0  ;;  %v1883_v43 = vadd.f32 %v1771_v4, %v1557_v8 }
 0x326   : > { %v1870_v27 = vadd.f32 %v1869_v22, %v1225_v26  ;;  %v1885_v46 = vadd.f32 %v1557_v8, %v1065_v5 }
 0x327   : > { %1305 = vst [vmem:[%s2976_s22 + $0x28] sm:$0xff] %v1868_v24 }
 0x328   : > { %v1774_v6 = vpop.f32.mrb[14].mxu1  ;;  %1304 = vst [vmem:[%s2976_s22 + $0x20] sm:$0xff] %v1870_v27 }
 0x329   : > { %v1075_v7 = vpop.f32.mrb[15].mxu1  ;;  %v1887_v49 = vadd.f32 %v1774_v6, %v1557_v8 }
 0x32a   : > { %v1889_v52 = vadd.f32 %v1557_v8, %v1075_v7 }
 0x391   : > { %v1790_v29 = vpop.f32.mrb[6].mxu0 }
 0x392   : > { %v1872_v30 = vadd.f32 %v1871_v25, %v1790_v29  ;;  %v1235_v32 = vpop.f32.mrb[7].mxu0 }
 0x393   : > { %v1874_v33 = vadd.f32 %v1873_v28, %v1235_v32 }
 0x394   : > { %1307 = vst [vmem:[%s2976_s22 + $0x38] sm:$0xff] %v1872_v30 }
 0x395   : > { %1306 = vst [vmem:[%s2976_s22 + $0x30] sm:$0xff] %v1874_v33  ;;  %v1793_v35 = vpop.f32.mrb[8].mxu0 }
 0x396   : > { %v1876_v36 = vadd.f32 %v1875_v31, %v1793_v35  ;;  %v1245_v38 = vpop.f32.mrb[9].mxu0 }
 0x397   : > { %v1878_v39 = vadd.f32 %v1877_v34, %v1245_v38 }
 0x398   : > { %1309 = vst [vmem:[%s2976_s22 + $0x48] sm:$0xff] %v1876_v36 }
 0x399   : > { %1308 = vst [vmem:[%s2976_s22 + $0x40] sm:$0xff] %v1878_v39  ;;  %v1796_v41 = vpop.f32.mrb[10].mxu0 }
 0x39a   : > { %v1880_v42 = vadd.f32 %v1879_v37, %v1796_v41  ;;  %v1255_v44 = vpop.f32.mrb[11].mxu0 }
 0x39b   : > { %v1882_v45 = vadd.f32 %v1881_v40, %v1255_v44 }
 0x39c   : > { %1311 = vst [vmem:[%s2976_s22 + $0x58] sm:$0xff] %v1880_v42 }
 0x39d   : > { %1310 = vst [vmem:[%s2976_s22 + $0x50] sm:$0xff] %v1882_v45  ;;  %v1799_v47 = vpop.f32.mrb[12].mxu0 }
 0x39e   : > { %v1884_v48 = vadd.f32 %v1883_v43, %v1799_v47  ;;  %v1265_v50 = vpop.f32.mrb[13].mxu0 }
 0x39f   : > { %v1886_v51 = vadd.f32 %v1885_v46, %v1265_v50 }
 0x3a0   : > { %1313 = vst [vmem:[%s2976_s22 + $0x68] sm:$0xff] %v1884_v48 }
 0x3a1   : > { %1312 = vst [vmem:[%s2976_s22 + $0x60] sm:$0xff] %v1886_v51  ;;  %v1802_v53 = vpop.f32.mrb[14].mxu0 }
 0x3a2   : > { %v1888_v54 = vadd.f32 %v1887_v49, %v1802_v53  ;;  %v1275_v55 = vpop.f32.mrb[15].mxu0 }
 0x3a3   : > { %v1890_v56 = vadd.f32 %v1889_v52, %v1275_v55 }
 0x3a4   : > { %1315 = vst [vmem:[%s2976_s22 + $0x78] sm:$0xff] %v1888_v54 }
 0x3a5   : > { %1314 = vst [vmem:[%s2976_s22 + $0x70] sm:$0xff] %v1890_v56 }
 0x3a6 PF: > { %s3303_s2 = sld [smem:[#allocation27_spill]]  ;;  %s3305_s19 = sld [smem:[#allocation42_spill]] }
 0x3a7   : > { %s1330_s0 = sshll.u32 %s2976_s22, 4  ;;  %s3127_s17 = scalar_lea.sflag [#allocation5], %s402_s13  ;;  %s3123_s0 = int_to_ptr.vmem [resolvable:$true] %s1330_s0 }
 0x3a8   : > { %s2277_s23 = scalar_lea.vmem %s3123_s0, 2048  ;;  %p3306_p0 = scmp.ne.s32.totalorder %s3285_s18, 0 }
 0x3a9   : > { %p2278_p4 = scmp.ne.s32.totalorder %s3123_s0, %s2277_s23  ;;  %s2458_s11 = smov [#allocation15]  }
 0x3aa   : > { %s2281_s1 = sshll.u32 %s2458_s11, 4  ;;  %s2282_s1 = int_to_ptr.vmem [resolvable:$false] %s2281_s1 }
 0x3ab   : > { %p2279_p13 = pnand %p2278_p4, %p3306_p0  ;;  %s2283_s12 = scalar_lea.vmem %s2282_s1, 4096 }
 0x3ac   : > { %s1583_s21 = sshll.u32 %s3303_s2, 11  ;;  %p2284_p8 = scmp.lt.s32.totalorder %s3123_s0, %s2282_s1 }
 0x3ad   : > { %s3120_s24 = scalar_lea.hbm %s3305_s19, %s1583_s21  ;;  %p2280_p10 = pneg %p2279_p13 }
 0x3ae   : > { %p2285_p12 = scmp.lt.s32.totalorder %s2283_s12, %s2277_s23 }
 0x3b0   : > { %p2286_p6 = por %p2285_p12, %p2284_p8 }
 0x3b2   : > { %p2287_p1 = pnand %p2286_p6, %p2280_p10 }
 0x3b4   : > { %2290 = shalt.err (!%p2287_p1)
}
 0x3b5   : > { %s2291_s27 = scalar_lea.hbm %s3120_s24, 2048  ;;  %s2295_s30 = scalar_lea.hbm %s3305_s19, 4096 }
 0x3b6   : > { %p2292_p11 = scmp.ne.s32.totalorder %s3120_s24, %s2291_s27  ;;  %p2296_p3 = scmp.lt.u32.totalorder %s3120_s24, %s3305_s19 }
 0x3b7   : > { %p2297_p5 = scmp.lt.u32.totalorder %s2295_s30, %s2291_s27  ;;  %p2299_p4 = scmp.lt.u32.totalorder %s2291_s27, %s3120_s24 }
 0x3b8   : > { %p2293_p9 = pnand %p2292_p11, %p3306_p0 }
 0x3b9   : > { %p2298_p7 = por %p2297_p5, %p2296_p3 }
 0x3ba   : > { %p2294_p2 = pneg %p2293_p9 }
 0x3bb   : > { %p2300_p13 = por %p2299_p4, %p2298_p7 }
 0x3bd   : > { %p2301_p10 = pnand %p2300_p13, %p2294_p2 }
 0x3bf   : > { %2304 = shalt.err (!%p2301_p10)
}
 0x3c0   : > { %s2459_s22 = smov 128   ;;  %s2460_s16 = smov 8  }
 0x3c1   : > { %1911 = dma.vmem_to_hbm [thread:$0]  (%p3306_p0), %s3123_s0, 2048, %s3120_s24, %s3127_s17, %s2459_s22, %s2459_s22, %s2460_s16  }
 0x3c2 PF: > { %s3307_s15 = sld [smem:[#allocation23_spill]]  ;;  %p1947_p8 = scmp.ge.s32.totalorder %s2443_s14, 2 }
 0x3c3   : > { %p3308_p12 = scmp.ne.s32.totalorder %s3286_s20, 0 }
 0x3c5   : > { %p1937_p6 = pnand %p1947_p8, %p3308_p12 }
 0x3c8   : > { %s1345_s2 = sand.u32 1, %s3307_s15  }
 0x3c9   : > { %s1346_s3 = scalar_lea.sflag [#allocation5], %s1345_s2 }
 0x3ca   : > { %2386 = dma.done.wait (!%p1937_p6), %s1346_s3, 2048  }
 0x3cb   : > { %2388 = vsyncadd (!%p1937_p6), %s1346_s3, 4294965248  ;;  %s30_s14 = sadd.s32 1, %s2443_s14   ;;  %s3310_s24 = sld [smem:[#allocation24_spill]] }
 0x3cc   : > { %p3156_p1 = scmp.ge.s32.totalorder %s30_s14, 6   ;;  %s3311_s18 = sld [smem:[#allocation33_spill]] }
 0x3cd   : > { %s3312_s4 = sld [smem:[#allocation25_spill]]  ;;  %s3313_s9 = sld [smem:[#allocation34_spill]] }
 0x3ce   : > { %s3314_s10 = sld [smem:[#allocation28_spill]]  ;;  %s3315_s11 = sld [smem:[#allocation29_spill]] }
 0x3cf   : > { %s3316_s12 = sld [smem:[#allocation31_spill]]  ;;  %s3317_s13 = sld [smem:[#allocation32_spill]] }
 0x3d0   : > { %s3318_s25 = smov %s2399_s26  ;;  %s3319_s26 = smov %s2826_s5 }
 0x3d1   : > { %s3320_s27 = smov %s2407_s28  ;;  %s3321_s28 = smov %s2411_s29 }
 0x3d2   : > { %s3322_s29 = smov %s3311_s18  ;;  %s3323_s30 = smov %s2419_s8 }
 0x3d3   : > { %s3324_s8 = smov %s3312_s4  ;;  %29 = sbr.rel (!%p3156_p1) target bundleno = 24 (0x18), region = 150 }
 0x3da   :  { %1351 = vsyncpa [#allocation4], 1 }
 0x3db   :  { %1353 = vsyncpa [#allocation4 + $0x1], 1 }
 0x3dc   :  { %1354 = vsyncpa [#allocation7], 1 }
 0x3dd   :  { %1356 = vsyncpa [#allocation7 + $0x1], 1 }
 0x3de   :  { %1357 = vsyncpa [#allocation10], 1 }
 0x3df   :  { %1359 = vsyncpa [#allocation10 + $0x1], 1 }
 0x3e0   :  { %1360 = vsyncpa [#allocation13], 1 }
 0x3e1   :  { %1361 = vsyncpa [#allocation5], 1 }
 0x3e2   :  { %1363 = vsyncpa [#allocation5 + $0x1], 1 }

</bundles_post_ra>
